<compile_context>
chip_gen: v7x
topology: tpu7x:2x2x1
jax: 0.10.0
libtpu: 0.0.40
codegen_flags: <defaults>
</compile_context>

<pallas_src>
import functools
import math

import jax
import jax.numpy as jnp
from jax.experimental import pallas as pl
from jax.experimental.pallas import tpu as pltpu

HIDDEN = 32
NUM_HEADS = 4
HEAD_DIM = HIDDEN // NUM_HEADS
FF_SIZE = 64
LN_EPS = 1e-5

# Row indices in the (16, 128) f32 bias / LayerNorm slab (all lane-0 aligned).
ROW_B_QKV1 = 0      # [bq1*scale | bk1 | bv1]  (96 wide)
ROW_B_O1 = 1
ROW_B_Q2 = 2        # bq2*scale
ROW_B_KV2 = 3       # [bk2 | bv2]              (64 wide)
ROW_B_O2 = 4
ROW_B_FF1 = 5       # (64 wide)
ROW_B_FF2 = 6
ROW_G1, ROW_BE1 = 7, 8
ROW_G2, ROW_BE2 = 9, 10
ROW_G3, ROW_BE3 = 11, 12
BIAS_ROWS = 16      # padded to the f32 (8, 128) tile


def decoder_layer_kernel(x_ref, enc_ref, w_qkv1_ref, w_o1_ref, w_q2_ref,
                         w_kv2_ref, w_o2_ref, w_ff1_ref, w_ff2_ref, b_ref,
                         out_ref, *, B, S, Se):
    """One batch tile of the decoder layer.

    x_ref    : (B*S,  H)  bf16  decoder input, batch-flattened
    enc_ref  : (B*Se, H)  bf16  encoder output, batch-flattened
    w_*_ref  : small bf16 weight refs (no in-kernel lane slicing of weights)
    b_ref    : (16, 128)  f32   row-packed biases / LayerNorm params
    out_ref  : (B*S, H)   bf16
    """
    H = HIDDEN
    x = x_ref[...]
    enc = enc_ref[...]
    b = b_ref[...]

    def bias(row, n):
        return b[row:row + 1, 0:n]                      # (1, n), lane-0 aligned

    def layernorm(z, grow, brow):
        # var = E[z^2] - mu^2 (shorter dependency chain than subtract-then-
        # square); gamma folded into the rsqrt factor; rsqrt uses the EUP slot.
        g = bias(grow, H)
        beta = bias(brow, H)
        mu = jnp.mean(z, axis=-1, keepdims=True)
        var = jnp.mean(z * z, axis=-1, keepdims=True) - mu * mu
        return (z - mu) * (g * jax.lax.rsqrt(var + LN_EPS)) + beta

    def attention(q, k, v, s_kv):
        # q: (B*S, H) f32, k/v: (B*s_kv, H) f32.  Softmax scale already folded
        # into Wq/bq.  Per-head contexts stay in vregs and are concatenated
        # along lanes (no VMEM scratch round-trip, no masked partial stores).
        qb = q.astype(jnp.bfloat16)
        kb = k.astype(jnp.bfloat16)
        vb = v.astype(jnp.bfloat16)
        outs = []
        for h in range(NUM_HEADS):                      # static, 4 iters
            lo = h * HEAD_DIM
            qh = qb[:, lo:lo + HEAD_DIM].reshape(B, S, HEAD_DIM)
            kh = kb[:, lo:lo + HEAD_DIM].reshape(B, s_kv, HEAD_DIM)
            vh = vb[:, lo:lo + HEAD_DIM].reshape(B, s_kv, HEAD_DIM)
            s = jnp.einsum('bqd,bkd->bqk', qh, kh,
                           preferred_element_type=jnp.float32)
            s = s - jnp.max(s, axis=-1, keepdims=True)
            p = jnp.exp(s)
            p = p * pl.reciprocal(jnp.sum(p, axis=-1, keepdims=True),
                                  approx=True)
            o = jnp.einsum('bqk,bkd->bqd', p.astype(jnp.bfloat16), vh,
                           preferred_element_type=jnp.float32)
            outs.append(o.reshape(B * S, HEAD_DIM))
        return jnp.concatenate(outs, axis=-1).astype(jnp.bfloat16)

    # ---- self attention + residual + layernorm1 (dropout = identity) ----
    qkv1 = (jnp.dot(x, w_qkv1_ref[...], preferred_element_type=jnp.float32)
            + bias(ROW_B_QKV1, 3 * H))
    ctx1 = attention(qkv1[:, 0:H], qkv1[:, H:2 * H], qkv1[:, 2 * H:3 * H], S)
    sa = (jnp.dot(ctx1, w_o1_ref[...], preferred_element_type=jnp.float32)
          + bias(ROW_B_O1, H))
    out1 = layernorm(x.astype(jnp.float32) + sa, ROW_G1, ROW_BE1)

    # ---- encoder-decoder attention + residual + layernorm2 ----
    q2 = (jnp.dot(out1.astype(jnp.bfloat16), w_q2_ref[...],
                  preferred_element_type=jnp.float32) + bias(ROW_B_Q2, H))
    kv2 = (jnp.dot(enc, w_kv2_ref[...], preferred_element_type=jnp.float32)
           + bias(ROW_B_KV2, 2 * H))
    ctx2 = attention(q2, kv2[:, 0:H], kv2[:, H:2 * H], Se)
    ca = (jnp.dot(ctx2, w_o2_ref[...], preferred_element_type=jnp.float32)
          + bias(ROW_B_O2, H))
    out2 = layernorm(out1 + ca, ROW_G2, ROW_BE2)

    # ---- feed forward (Linear -> ReLU -> Linear) + residual + layernorm3 ----
    h1 = (jnp.dot(out2.astype(jnp.bfloat16), w_ff1_ref[...],
                  preferred_element_type=jnp.float32) + bias(ROW_B_FF1, FF_SIZE))
    h1 = jnp.maximum(h1, 0.0)
    ff = (jnp.dot(h1.astype(jnp.bfloat16), w_ff2_ref[...],
                  preferred_element_type=jnp.float32) + bias(ROW_B_FF2, H))
    out3 = layernorm(out2 + ff, ROW_G3, ROW_BE3)

    # TODO(synk): with H=32 this is a 32/128-lane masked store; a lane-dense
    # (rows//4, 128) output layout would need an in-kernel cross-lane reshape
    # that Mosaic may not lower for this shape, so it is left row-major.
    out_ref[...] = out3.astype(out_ref.dtype)


def _default_batch_tile(B, S, Se):
    """Prefer a grid of >= 2 'parallel' batch tiles (so v7x's two TensorCores
    both get work) as long as each tile keeps the bf16 (16,128) sublane tiling
    intact and the per-tile row count stays VMEM-friendly (v7x: 64 MiB)."""
    row_cap = 16384
    for bt in range(B // 2, 0, -1):
        if B % bt:
            continue
        if (bt * S) % 16 or (bt * Se) % 16:
            continue
        if bt * max(S, Se) > row_cap:
            continue
        return bt
    return B


def decoder_layer(x, encoder_output, packed_params, *, batch_tile=None):
    """x: (B, S, H), encoder_output: (B, Se, H); packed_params from
    pack_params().  Returns (B, S, H) float32."""
    (w_qkv1, w_o1, w_q2, w_kv2, w_o2, w_ff1, w_ff2, b_slab) = packed_params
    B, S, H = x.shape
    _, Se, _ = encoder_output.shape
    assert H == HIDDEN
    BT = _default_batch_tile(B, S, Se) if batch_tile is None else batch_tile
    assert B % BT == 0
    grid = B // BT
    if grid > 1:
        assert (BT * S) % 16 == 0 and (BT * Se) % 16 == 0, \
            "batch tile must keep the bf16 (16,128) tiling when grid > 1"

    # Activations cross the pallas_call boundary as bf16 (kernel is HBM-bound
    # at scale); batch is flattened into rows so every projection / FF / LN is
    # one (rows, H) matmul per grid step.
    x2d = x.reshape(B * S, H).astype(jnp.bfloat16)
    enc2d = encoder_output.reshape(B * Se, H).astype(jnp.bfloat16)

    kernel = functools.partial(decoder_layer_kernel, B=BT, S=S, Se=Se)

    weights = (w_qkv1, w_o1, w_q2, w_kv2, w_o2, w_ff1, w_ff2)
    weight_specs = [pl.BlockSpec(w.shape, lambda i: (0, 0)) for w in weights]

    out2d = pl.pallas_call(
        kernel,
        out_shape=jax.ShapeDtypeStruct((B * S, H), jnp.bfloat16),
        grid=(grid,),
        in_specs=[
            pl.BlockSpec((BT * S, H), lambda i: (i, 0)),     # x batch tile
            pl.BlockSpec((BT * Se, H), lambda i: (i, 0)),    # encoder tile
            *weight_specs,                                   # 7 small weights
            pl.BlockSpec(b_slab.shape, lambda i: (0, 0)),    # bias/LN slab
        ],
        out_specs=pl.BlockSpec((BT * S, H), lambda i: (i, 0)),
        compiler_params=pltpu.CompilerParams(
            dimension_semantics=("parallel",),
            # Explicit and generation-safe: above v5e's 16 MiB scoped default,
            # at v6e/v7x's 32 MiB default (v7x physical VMEM is only 64 MiB).
            vmem_limit_bytes=32 * 1024 * 1024),
    )(x2d, enc2d, *weights, b_slab)
    return out2d.reshape(B, S, H).astype(jnp.float32)


def init_params(key):
    """Deterministic parameter init. Linear weights stored as (in, out);
    biases / layernorm params stored as (1, N) rows."""
    keys = jax.random.split(key, 20)
    ki = iter(keys)

    def lin(k, fan_in, fan_out):
        return 0.02 * jax.random.normal(k, (fan_in, fan_out), jnp.float32)

    def bias(k, n):
        return 0.02 * jax.random.normal(k, (1, n), jnp.float32)

    # self-attention
    wq1, wk1, wv1, wo1 = (lin(next(ki), HIDDEN, HIDDEN) for _ in range(4))
    bq1, bk1, bv1, bo1 = (bias(next(ki), HIDDEN) for _ in range(4))
    # encoder-decoder attention
    wq2, wk2, wv2, wo2 = (lin(next(ki), HIDDEN, HIDDEN) for _ in range(4))
    bq2, bk2, bv2, bo2 = (bias(next(ki), HIDDEN) for _ in range(4))
    # layernorms (PyTorch default: weight=1, bias=0)
    g1 = jnp.ones((1, HIDDEN), jnp.float32); be1 = jnp.zeros((1, HIDDEN), jnp.float32)
    g2 = jnp.ones((1, HIDDEN), jnp.float32); be2 = jnp.zeros((1, HIDDEN), jnp.float32)
    g3 = jnp.ones((1, HIDDEN), jnp.float32); be3 = jnp.zeros((1, HIDDEN), jnp.float32)
    # feed forward
    w1 = lin(next(ki), HIDDEN, FF_SIZE); b1 = bias(next(ki), FF_SIZE)
    w2 = lin(next(ki), FF_SIZE, HIDDEN); b2 = bias(next(ki), HIDDEN)

    return (wq1, wk1, wv1, wo1, bq1, bk1, bv1, bo1,
            wq2, wk2, wv2, wo2, bq2, bk2, bv2, bo2,
            g1, be1, g2, be2, g3, be3,
            w1, b1, w2, b2)


def pack_params(params):
    """Pack the 26 parameter arrays into TPU-friendly refs: 7 small bf16
    weight matrices (fused QKV for self-attn, fused KV for cross-attn; the
    1/sqrt(head_dim) softmax scale folded into Wq/bq) and one row-packed
    (16, 128) f32 bias / LayerNorm slab."""
    (wq1, wk1, wv1, wo1, bq1, bk1, bv1, bo1,
     wq2, wk2, wv2, wo2, bq2, bk2, bv2, bo2,
     g1, be1, g2, be2, g3, be3,
     w1, b1, w2, b2) = params
    scale = 1.0 / math.sqrt(HEAD_DIM)
    bf = jnp.bfloat16

    w_qkv1 = jnp.concatenate([wq1 * scale, wk1, wv1], axis=1).astype(bf)
    w_kv2 = jnp.concatenate([wk2, wv2], axis=1).astype(bf)

    def put(slab, row, vec):
        vec = vec.reshape(-1)
        return slab.at[row, 0:vec.shape[0]].set(vec)

    b_slab = jnp.zeros((BIAS_ROWS, 128), jnp.float32)
    b_slab = put(b_slab, ROW_B_QKV1,
                 jnp.concatenate([bq1 * scale, bk1, bv1], axis=1))
    b_slab = put(b_slab, ROW_B_O1, bo1)
    b_slab = put(b_slab, ROW_B_Q2, bq2 * scale)
    b_slab = put(b_slab, ROW_B_KV2, jnp.concatenate([bk2, bv2], axis=1))
    b_slab = put(b_slab, ROW_B_O2, bo2)
    b_slab = put(b_slab, ROW_B_FF1, b1)
    b_slab = put(b_slab, ROW_B_FF2, b2)
    b_slab = put(b_slab, ROW_G1, g1)
    b_slab = put(b_slab, ROW_BE1, be1)
    b_slab = put(b_slab, ROW_G2, g2)
    b_slab = put(b_slab, ROW_BE2, be2)
    b_slab = put(b_slab, ROW_G3, g3)
    b_slab = put(b_slab, ROW_BE3, be3)

    return (w_qkv1, wo1.astype(bf), (wq2 * scale).astype(bf), w_kv2,
            wo2.astype(bf), w1.astype(bf), w2.astype(bf), b_slab)


def decoder_layer_ref(x, enc, params):
    """Pure-JAX (float32, exact softmax) reference for the sanity check."""
    (wq1, wk1, wv1, wo1, bq1, bk1, bv1, bo1,
     wq2, wk2, wv2, wo2, bq2, bk2, bv2, bo2,
     g1, be1, g2, be2, g3, be3,
     w1, b1, w2, b2) = params

    def mha(q_in, kv_in, wq, wk, wv, wo, bq, bk, bv, bo):
        B, S, H = q_in.shape
        Se = kv_in.shape[1]
        q = (q_in @ wq + bq).reshape(B, S, NUM_HEADS, HEAD_DIM).transpose(0, 2, 1, 3)
        k = (kv_in @ wk + bk).reshape(B, Se, NUM_HEADS, HEAD_DIM).transpose(0, 2, 1, 3)
        v = (kv_in @ wv + bv).reshape(B, Se, NUM_HEADS, HEAD_DIM).transpose(0, 2, 1, 3)
        s = jnp.einsum('bhqd,bhkd->bhqk', q, k) / math.sqrt(HEAD_DIM)
        p = jax.nn.softmax(s, axis=-1)
        o = jnp.einsum('bhqk,bhkd->bhqd', p, v).transpose(0, 2, 1, 3).reshape(B, S, H)
        return o @ wo + bo

    def ln(z, g, b):
        mu = jnp.mean(z, axis=-1, keepdims=True)
        var = jnp.mean((z - mu) ** 2, axis=-1, keepdims=True)
        return (z - mu) / jnp.sqrt(var + LN_EPS) * g + b

    out1 = ln(x + mha(x, x, wq1, wk1, wv1, wo1, bq1, bk1, bv1, bo1), g1, be1)
    out2 = ln(out1 + mha(out1, enc, wq2, wk2, wv2, wo2, bq2, bk2, bv2, bo2), g2, be2)
    ff = jnp.maximum(out2 @ w1 + b1, 0.0) @ w2 + b2
    return ln(out2 + ff, g3, be3)


if __name__ == "__main__":
    B, S, S_ENC = 2, 8, 8
    key = jax.random.PRNGKey(0)
    kx, kenc, kp = jax.random.split(key, 3)
    x = jax.random.normal(kx, (B, S, HIDDEN), jnp.float32)
    enc = jax.random.normal(kenc, (B, S_ENC, HIDDEN), jnp.float32)
    params = init_params(kp)
    packed = pack_params(params)

    out = decoder_layer(x, enc, packed)
    out = jax.block_until_ready(out)

    ref = decoder_layer_ref(x, enc, params)
    assert out.shape == (B, S, HIDDEN)
    # bf16 activations/weights + approx softmax reciprocal -> loosened
    # tolerance vs the float32 reference.
    assert jnp.allclose(out, ref, atol=7.5e-2, rtol=5e-2), "mismatch vs reference"

    print("KERNEL_OK")
</pallas_src>

<mosaic_0001>
module attributes {stable_mosaic.version = 11 : i64} {
  func.func @decoder_layer_kernel(%arg0: i32, %arg1: memref<16x32xbf16, #tpu.memory_space<vmem>>, %arg2: memref<16x32xbf16, #tpu.memory_space<vmem>>, %arg3: memref<32x96xbf16, #tpu.memory_space<vmem>>, %arg4: memref<32x32xbf16, #tpu.memory_space<vmem>>, %arg5: memref<32x32xbf16, #tpu.memory_space<vmem>>, %arg6: memref<32x64xbf16, #tpu.memory_space<vmem>>, %arg7: memref<32x32xbf16, #tpu.memory_space<vmem>>, %arg8: memref<32x64xbf16, #tpu.memory_space<vmem>>, %arg9: memref<64x32xbf16, #tpu.memory_space<vmem>>, %arg10: memref<16x128xf32, #tpu.memory_space<vmem>>, %arg11: memref<16x32xbf16, #tpu.memory_space<vmem>>) attributes {dimension_semantics = [#tpu.dimension_semantics<parallel>], iteration_bounds = array<i64: 1>, scalar_prefetch = 0 : i64, scratch_operands = 0 : i64, tpu.core_type = #tpu.core_type<tc>, window_params = [{transform_indices = @transform_0, window_bounds = array<i64: 16, 32>}, {transform_indices = @transform_1, window_bounds = array<i64: 16, 32>}, {pipeline_mode = #tpu.pipeline_mode<synchronous>, transform_indices = @transform_2, window_bounds = array<i64: 32, 96>}, {pipeline_mode = #tpu.pipeline_mode<synchronous>, transform_indices = @transform_3, window_bounds = array<i64: 32, 32>}, {pipeline_mode = #tpu.pipeline_mode<synchronous>, transform_indices = @transform_4, window_bounds = array<i64: 32, 32>}, {pipeline_mode = #tpu.pipeline_mode<synchronous>, transform_indices = @transform_5, window_bounds = array<i64: 32, 64>}, {pipeline_mode = #tpu.pipeline_mode<synchronous>, transform_indices = @transform_6, window_bounds = array<i64: 32, 32>}, {pipeline_mode = #tpu.pipeline_mode<synchronous>, transform_indices = @transform_7, window_bounds = array<i64: 32, 64>}, {pipeline_mode = #tpu.pipeline_mode<synchronous>, transform_indices = @transform_8, window_bounds = array<i64: 64, 32>}, {pipeline_mode = #tpu.pipeline_mode<synchronous>, transform_indices = @transform_9, window_bounds = array<i64: 16, 128>}, {transform_indices = @transform_10, window_bounds = array<i64: 16, 32>}]} {
    %c0 = arith.constant 0 : index
    %c0_0 = arith.constant 0 : index
    %0 = vector.load %arg1[%c0, %c0_0] : memref<16x32xbf16, #tpu.memory_space<vmem>>, vector<16x32xbf16>
    %c0_1 = arith.constant 0 : index
    %c0_2 = arith.constant 0 : index
    %1 = vector.load %arg2[%c0_1, %c0_2] : memref<16x32xbf16, #tpu.memory_space<vmem>>, vector<16x32xbf16>
    %c0_3 = arith.constant 0 : index
    %c0_4 = arith.constant 0 : index
    %2 = vector.load %arg10[%c0_3, %c0_4] : memref<16x128xf32, #tpu.memory_space<vmem>>, vector<16x128xf32>
    %c0_5 = arith.constant 0 : index
    %c0_6 = arith.constant 0 : index
    %3 = vector.load %arg3[%c0_5, %c0_6] : memref<32x96xbf16, #tpu.memory_space<vmem>>, vector<32x96xbf16>
    %cst = arith.constant dense<0.000000e+00> : vector<16x96xf32>
    %4 = tpu.matmul %0, %3, %cst {dimension_numbers = #tpu.dot_dimension_numbers<[1], [0], [0], [1], [0, 0, 1, 1], [], []>} : vector<16x32xbf16>, vector<32x96xbf16>, vector<16x96xf32> -> vector<16x96xf32>
    %5 = vector.extract_strided_slice %2 {offsets = [0, 0], sizes = [1, 96], strides = [1, 1]} : vector<16x128xf32> to vector<1x96xf32>
    %6 = vector.broadcast %5 : vector<1x96xf32> to vector<16x96xf32>
    %7 = arith.addf %4, %6 : vector<16x96xf32>
    %8 = vector.extract_strided_slice %7 {offsets = [0, 0], sizes = [16, 32], strides = [1, 1]} : vector<16x96xf32> to vector<16x32xf32>
    %9 = vector.extract_strided_slice %7 {offsets = [0, 32], sizes = [16, 32], strides = [1, 1]} : vector<16x96xf32> to vector<16x32xf32>
    %10 = vector.extract_strided_slice %7 {offsets = [0, 64], sizes = [16, 32], strides = [1, 1]} : vector<16x96xf32> to vector<16x32xf32>
    %11 = arith.truncf %8 : vector<16x32xf32> to vector<16x32xbf16>
    %12 = arith.truncf %9 : vector<16x32xf32> to vector<16x32xbf16>
    %13 = arith.truncf %10 : vector<16x32xf32> to vector<16x32xbf16>
    %14 = vector.extract_strided_slice %11 {offsets = [0, 0], sizes = [16, 8], strides = [1, 1]} : vector<16x32xbf16> to vector<16x8xbf16>
    %15 = vector.shape_cast %14 : vector<16x8xbf16> to vector<2x8x8xbf16>
    %16 = vector.extract_strided_slice %12 {offsets = [0, 0], sizes = [16, 8], strides = [1, 1]} : vector<16x32xbf16> to vector<16x8xbf16>
    %17 = vector.shape_cast %16 : vector<16x8xbf16> to vector<2x8x8xbf16>
    %18 = vector.extract_strided_slice %13 {offsets = [0, 0], sizes = [16, 8], strides = [1, 1]} : vector<16x32xbf16> to vector<16x8xbf16>
    %19 = vector.shape_cast %18 : vector<16x8xbf16> to vector<2x8x8xbf16>
    "tpu.trace_start"() <{level = 10 : i32, message = "bqd,bkd->bqk"}> : () -> ()
    %cst_7 = arith.constant dense<0.000000e+00> : vector<2x8x8xf32>
    %20 = tpu.matmul %15, %17, %cst_7 {dimension_numbers = #tpu.dot_dimension_numbers<[2], [2], [1], [1], [0, 0, 0, 1, 1, 1], [0], [0]>} : vector<2x8x8xbf16>, vector<2x8x8xbf16>, vector<2x8x8xf32> -> vector<2x8x8xf32>
    "tpu.trace_stop"() : () -> ()
    %cst_8 = arith.constant dense<0xFF800000> : vector<2x8xf32>
    %21 = vector.multi_reduction <maximumf>, %20, %cst_8 [2] : vector<2x8x8xf32> to vector<2x8xf32>
    %22 = vector.shape_cast %21 : vector<2x8xf32> to vector<2x8x1xf32>
    %23 = vector.broadcast %22 : vector<2x8x1xf32> to vector<2x8x8xf32>
    %24 = arith.subf %20, %23 : vector<2x8x8xf32>
    %25 = math.exp %24 : vector<2x8x8xf32>
    %cst_9 = arith.constant dense<0.000000e+00> : vector<2x8xf32>
    %26 = vector.multi_reduction <add>, %25, %cst_9 [2] : vector<2x8x8xf32> to vector<2x8xf32>
    %27 = vector.shape_cast %26 : vector<2x8xf32> to vector<2x8x1xf32>
    %28 = tpu.reciprocal %27 {approx = true} : vector<2x8x1xf32> -> vector<2x8x1xf32>
    %29 = vector.broadcast %28 : vector<2x8x1xf32> to vector<2x8x8xf32>
    %30 = arith.mulf %25, %29 : vector<2x8x8xf32>
    %31 = arith.truncf %30 : vector<2x8x8xf32> to vector<2x8x8xbf16>
    "tpu.trace_start"() <{level = 10 : i32, message = "bqk,bkd->bqd"}> : () -> ()
    %cst_10 = arith.constant dense<0.000000e+00> : vector<2x8x8xf32>
    %32 = tpu.matmul %31, %19, %cst_10 {dimension_numbers = #tpu.dot_dimension_numbers<[2], [1], [1], [2], [0, 0, 0, 1, 1, 2], [0], [0]>} : vector<2x8x8xbf16>, vector<2x8x8xbf16>, vector<2x8x8xf32> -> vector<2x8x8xf32>
    "tpu.trace_stop"() : () -> ()
    %33 = vector.shape_cast %32 : vector<2x8x8xf32> to vector<16x8xf32>
    %34 = vector.extract_strided_slice %11 {offsets = [0, 8], sizes = [16, 8], strides = [1, 1]} : vector<16x32xbf16> to vector<16x8xbf16>
    %35 = vector.shape_cast %34 : vector<16x8xbf16> to vector<2x8x8xbf16>
    %36 = vector.extract_strided_slice %12 {offsets = [0, 8], sizes = [16, 8], strides = [1, 1]} : vector<16x32xbf16> to vector<16x8xbf16>
    %37 = vector.shape_cast %36 : vector<16x8xbf16> to vector<2x8x8xbf16>
    %38 = vector.extract_strided_slice %13 {offsets = [0, 8], sizes = [16, 8], strides = [1, 1]} : vector<16x32xbf16> to vector<16x8xbf16>
    %39 = vector.shape_cast %38 : vector<16x8xbf16> to vector<2x8x8xbf16>
    "tpu.trace_start"() <{level = 10 : i32, message = "bqd,bkd->bqk"}> : () -> ()
    %cst_11 = arith.constant dense<0.000000e+00> : vector<2x8x8xf32>
    %40 = tpu.matmul %35, %37, %cst_11 {dimension_numbers = #tpu.dot_dimension_numbers<[2], [2], [1], [1], [0, 0, 0, 1, 1, 1], [0], [0]>} : vector<2x8x8xbf16>, vector<2x8x8xbf16>, vector<2x8x8xf32> -> vector<2x8x8xf32>
    "tpu.trace_stop"() : () -> ()
    %cst_12 = arith.constant dense<0xFF800000> : vector<2x8xf32>
    %41 = vector.multi_reduction <maximumf>, %40, %cst_12 [2] : vector<2x8x8xf32> to vector<2x8xf32>
    %42 = vector.shape_cast %41 : vector<2x8xf32> to vector<2x8x1xf32>
    %43 = vector.broadcast %42 : vector<2x8x1xf32> to vector<2x8x8xf32>
    %44 = arith.subf %40, %43 : vector<2x8x8xf32>
    %45 = math.exp %44 : vector<2x8x8xf32>
    %cst_13 = arith.constant dense<0.000000e+00> : vector<2x8xf32>
    %46 = vector.multi_reduction <add>, %45, %cst_13 [2] : vector<2x8x8xf32> to vector<2x8xf32>
    %47 = vector.shape_cast %46 : vector<2x8xf32> to vector<2x8x1xf32>
    %48 = tpu.reciprocal %47 {approx = true} : vector<2x8x1xf32> -> vector<2x8x1xf32>
    %49 = vector.broadcast %48 : vector<2x8x1xf32> to vector<2x8x8xf32>
    %50 = arith.mulf %45, %49 : vector<2x8x8xf32>
    %51 = arith.truncf %50 : vector<2x8x8xf32> to vector<2x8x8xbf16>
    "tpu.trace_start"() <{level = 10 : i32, message = "bqk,bkd->bqd"}> : () -> ()
    %cst_14 = arith.constant dense<0.000000e+00> : vector<2x8x8xf32>
    %52 = tpu.matmul %51, %39, %cst_14 {dimension_numbers = #tpu.dot_dimension_numbers<[2], [1], [1], [2], [0, 0, 0, 1, 1, 2], [0], [0]>} : vector<2x8x8xbf16>, vector<2x8x8xbf16>, vector<2x8x8xf32> -> vector<2x8x8xf32>
    "tpu.trace_stop"() : () -> ()
    %53 = vector.shape_cast %52 : vector<2x8x8xf32> to vector<16x8xf32>
    %54 = vector.extract_strided_slice %11 {offsets = [0, 16], sizes = [16, 8], strides = [1, 1]} : vector<16x32xbf16> to vector<16x8xbf16>
    %55 = vector.shape_cast %54 : vector<16x8xbf16> to vector<2x8x8xbf16>
    %56 = vector.extract_strided_slice %12 {offsets = [0, 16], sizes = [16, 8], strides = [1, 1]} : vector<16x32xbf16> to vector<16x8xbf16>
    %57 = vector.shape_cast %56 : vector<16x8xbf16> to vector<2x8x8xbf16>
    %58 = vector.extract_strided_slice %13 {offsets = [0, 16], sizes = [16, 8], strides = [1, 1]} : vector<16x32xbf16> to vector<16x8xbf16>
    %59 = vector.shape_cast %58 : vector<16x8xbf16> to vector<2x8x8xbf16>
    "tpu.trace_start"() <{level = 10 : i32, message = "bqd,bkd->bqk"}> : () -> ()
    %cst_15 = arith.constant dense<0.000000e+00> : vector<2x8x8xf32>
    %60 = tpu.matmul %55, %57, %cst_15 {dimension_numbers = #tpu.dot_dimension_numbers<[2], [2], [1], [1], [0, 0, 0, 1, 1, 1], [0], [0]>} : vector<2x8x8xbf16>, vector<2x8x8xbf16>, vector<2x8x8xf32> -> vector<2x8x8xf32>
    "tpu.trace_stop"() : () -> ()
    %cst_16 = arith.constant dense<0xFF800000> : vector<2x8xf32>
    %61 = vector.multi_reduction <maximumf>, %60, %cst_16 [2] : vector<2x8x8xf32> to vector<2x8xf32>
    %62 = vector.shape_cast %61 : vector<2x8xf32> to vector<2x8x1xf32>
    %63 = vector.broadcast %62 : vector<2x8x1xf32> to vector<2x8x8xf32>
    %64 = arith.subf %60, %63 : vector<2x8x8xf32>
    %65 = math.exp %64 : vector<2x8x8xf32>
    %cst_17 = arith.constant dense<0.000000e+00> : vector<2x8xf32>
    %66 = vector.multi_reduction <add>, %65, %cst_17 [2] : vector<2x8x8xf32> to vector<2x8xf32>
    %67 = vector.shape_cast %66 : vector<2x8xf32> to vector<2x8x1xf32>
    %68 = tpu.reciprocal %67 {approx = true} : vector<2x8x1xf32> -> vector<2x8x1xf32>
    %69 = vector.broadcast %68 : vector<2x8x1xf32> to vector<2x8x8xf32>
    %70 = arith.mulf %65, %69 : vector<2x8x8xf32>
    %71 = arith.truncf %70 : vector<2x8x8xf32> to vector<2x8x8xbf16>
    "tpu.trace_start"() <{level = 10 : i32, message = "bqk,bkd->bqd"}> : () -> ()
    %cst_18 = arith.constant dense<0.000000e+00> : vector<2x8x8xf32>
    %72 = tpu.matmul %71, %59, %cst_18 {dimension_numbers = #tpu.dot_dimension_numbers<[2], [1], [1], [2], [0, 0, 0, 1, 1, 2], [0], [0]>} : vector<2x8x8xbf16>, vector<2x8x8xbf16>, vector<2x8x8xf32> -> vector<2x8x8xf32>
    "tpu.trace_stop"() : () -> ()
    %73 = vector.shape_cast %72 : vector<2x8x8xf32> to vector<16x8xf32>
    %74 = vector.extract_strided_slice %11 {offsets = [0, 24], sizes = [16, 8], strides = [1, 1]} : vector<16x32xbf16> to vector<16x8xbf16>
    %75 = vector.shape_cast %74 : vector<16x8xbf16> to vector<2x8x8xbf16>
    %76 = vector.extract_strided_slice %12 {offsets = [0, 24], sizes = [16, 8], strides = [1, 1]} : vector<16x32xbf16> to vector<16x8xbf16>
    %77 = vector.shape_cast %76 : vector<16x8xbf16> to vector<2x8x8xbf16>
    %78 = vector.extract_strided_slice %13 {offsets = [0, 24], sizes = [16, 8], strides = [1, 1]} : vector<16x32xbf16> to vector<16x8xbf16>
    %79 = vector.shape_cast %78 : vector<16x8xbf16> to vector<2x8x8xbf16>
    "tpu.trace_start"() <{level = 10 : i32, message = "bqd,bkd->bqk"}> : () -> ()
    %cst_19 = arith.constant dense<0.000000e+00> : vector<2x8x8xf32>
    %80 = tpu.matmul %75, %77, %cst_19 {dimension_numbers = #tpu.dot_dimension_numbers<[2], [2], [1], [1], [0, 0, 0, 1, 1, 1], [0], [0]>} : vector<2x8x8xbf16>, vector<2x8x8xbf16>, vector<2x8x8xf32> -> vector<2x8x8xf32>
    "tpu.trace_stop"() : () -> ()
    %cst_20 = arith.constant dense<0xFF800000> : vector<2x8xf32>
    %81 = vector.multi_reduction <maximumf>, %80, %cst_20 [2] : vector<2x8x8xf32> to vector<2x8xf32>
    %82 = vector.shape_cast %81 : vector<2x8xf32> to vector<2x8x1xf32>
    %83 = vector.broadcast %82 : vector<2x8x1xf32> to vector<2x8x8xf32>
    %84 = arith.subf %80, %83 : vector<2x8x8xf32>
    %85 = math.exp %84 : vector<2x8x8xf32>
    %cst_21 = arith.constant dense<0.000000e+00> : vector<2x8xf32>
    %86 = vector.multi_reduction <add>, %85, %cst_21 [2] : vector<2x8x8xf32> to vector<2x8xf32>
    %87 = vector.shape_cast %86 : vector<2x8xf32> to vector<2x8x1xf32>
    %88 = tpu.reciprocal %87 {approx = true} : vector<2x8x1xf32> -> vector<2x8x1xf32>
    %89 = vector.broadcast %88 : vector<2x8x1xf32> to vector<2x8x8xf32>
    %90 = arith.mulf %85, %89 : vector<2x8x8xf32>
    %91 = arith.truncf %90 : vector<2x8x8xf32> to vector<2x8x8xbf16>
    "tpu.trace_start"() <{level = 10 : i32, message = "bqk,bkd->bqd"}> : () -> ()
    %cst_22 = arith.constant dense<0.000000e+00> : vector<2x8x8xf32>
    %92 = tpu.matmul %91, %79, %cst_22 {dimension_numbers = #tpu.dot_dimension_numbers<[2], [1], [1], [2], [0, 0, 0, 1, 1, 2], [0], [0]>} : vector<2x8x8xbf16>, vector<2x8x8xbf16>, vector<2x8x8xf32> -> vector<2x8x8xf32>
    "tpu.trace_stop"() : () -> ()
    %93 = vector.shape_cast %92 : vector<2x8x8xf32> to vector<16x8xf32>
    %94 = tpu.concatenate %33, %53, %73, %93 in 1 : vector<16x8xf32>, vector<16x8xf32>, vector<16x8xf32>, vector<16x8xf32> -> vector<16x32xf32>
    %95 = arith.truncf %94 : vector<16x32xf32> to vector<16x32xbf16>
    %c0_23 = arith.constant 0 : index
    %c0_24 = arith.constant 0 : index
    %96 = vector.load %arg4[%c0_23, %c0_24] : memref<32x32xbf16, #tpu.memory_space<vmem>>, vector<32x32xbf16>
    %cst_25 = arith.constant dense<0.000000e+00> : vector<16x32xf32>
    %97 = tpu.matmul %95, %96, %cst_25 {dimension_numbers = #tpu.dot_dimension_numbers<[1], [0], [0], [1], [0, 0, 1, 1], [], []>} : vector<16x32xbf16>, vector<32x32xbf16>, vector<16x32xf32> -> vector<16x32xf32>
    %98 = vector.extract_strided_slice %2 {offsets = [1, 0], sizes = [1, 32], strides = [1, 1]} : vector<16x128xf32> to vector<1x32xf32>
    %99 = vector.broadcast %98 : vector<1x32xf32> to vector<16x32xf32>
    %100 = arith.addf %97, %99 : vector<16x32xf32>
    %101 = arith.extf %0 : vector<16x32xbf16> to vector<16x32xf32>
    %102 = arith.addf %101, %100 : vector<16x32xf32>
    %103 = vector.extract_strided_slice %2 {offsets = [7, 0], sizes = [1, 32], strides = [1, 1]} : vector<16x128xf32> to vector<1x32xf32>
    %104 = vector.extract_strided_slice %2 {offsets = [8, 0], sizes = [1, 32], strides = [1, 1]} : vector<16x128xf32> to vector<1x32xf32>
    %cst_26 = arith.constant dense<0.000000e+00> : vector<16xf32>
    %105 = vector.multi_reduction <add>, %102, %cst_26 [1] : vector<16x32xf32> to vector<16xf32>
    %106 = vector.shape_cast %105 : vector<16xf32> to vector<16x1xf32>
    %cst_27 = arith.constant 3.200000e+01 : f32
    %107 = vector.broadcast %cst_27 : f32 to vector<16x1xf32>
    %108 = arith.divf %106, %107 : vector<16x1xf32>
    %109 = arith.mulf %102, %102 : vector<16x32xf32>
    %cst_28 = arith.constant dense<0.000000e+00> : vector<16xf32>
    %110 = vector.multi_reduction <add>, %109, %cst_28 [1] : vector<16x32xf32> to vector<16xf32>
    %111 = vector.shape_cast %110 : vector<16xf32> to vector<16x1xf32>
    %cst_29 = arith.constant 3.200000e+01 : f32
    %112 = vector.broadcast %cst_29 : f32 to vector<16x1xf32>
    %113 = arith.divf %111, %112 : vector<16x1xf32>
    %114 = arith.mulf %108, %108 : vector<16x1xf32>
    %115 = arith.subf %113, %114 : vector<16x1xf32>
    %116 = vector.broadcast %108 : vector<16x1xf32> to vector<16x32xf32>
    %117 = arith.subf %102, %116 : vector<16x32xf32>
    %cst_30 = arith.constant 9.99999974E-6 : f32
    %118 = vector.broadcast %cst_30 : f32 to vector<16x1xf32>
    %119 = arith.addf %115, %118 : vector<16x1xf32>
    %120 = math.rsqrt %119 : vector<16x1xf32>
    %121 = vector.broadcast %103 : vector<1x32xf32> to vector<16x32xf32>
    %122 = vector.broadcast %120 : vector<16x1xf32> to vector<16x32xf32>
    %123 = arith.mulf %121, %122 : vector<16x32xf32>
    %124 = arith.mulf %117, %123 : vector<16x32xf32>
    %125 = vector.broadcast %104 : vector<1x32xf32> to vector<16x32xf32>
    %126 = arith.addf %124, %125 : vector<16x32xf32>
    %127 = arith.truncf %126 : vector<16x32xf32> to vector<16x32xbf16>
    %c0_31 = arith.constant 0 : index
    %c0_32 = arith.constant 0 : index
    %128 = vector.load %arg5[%c0_31, %c0_32] : memref<32x32xbf16, #tpu.memory_space<vmem>>, vector<32x32xbf16>
    %cst_33 = arith.constant dense<0.000000e+00> : vector<16x32xf32>
    %129 = tpu.matmul %127, %128, %cst_33 {dimension_numbers = #tpu.dot_dimension_numbers<[1], [0], [0], [1], [0, 0, 1, 1], [], []>} : vector<16x32xbf16>, vector<32x32xbf16>, vector<16x32xf32> -> vector<16x32xf32>
    %130 = vector.extract_strided_slice %2 {offsets = [2, 0], sizes = [1, 32], strides = [1, 1]} : vector<16x128xf32> to vector<1x32xf32>
    %131 = vector.broadcast %130 : vector<1x32xf32> to vector<16x32xf32>
    %132 = arith.addf %129, %131 : vector<16x32xf32>
    %c0_34 = arith.constant 0 : index
    %c0_35 = arith.constant 0 : index
    %133 = vector.load %arg6[%c0_34, %c0_35] : memref<32x64xbf16, #tpu.memory_space<vmem>>, vector<32x64xbf16>
    %cst_36 = arith.constant dense<0.000000e+00> : vector<16x64xf32>
    %134 = tpu.matmul %1, %133, %cst_36 {dimension_numbers = #tpu.dot_dimension_numbers<[1], [0], [0], [1], [0, 0, 1, 1], [], []>} : vector<16x32xbf16>, vector<32x64xbf16>, vector<16x64xf32> -> vector<16x64xf32>
    %135 = vector.extract_strided_slice %2 {offsets = [3, 0], sizes = [1, 64], strides = [1, 1]} : vector<16x128xf32> to vector<1x64xf32>
    %136 = vector.broadcast %135 : vector<1x64xf32> to vector<16x64xf32>
    %137 = arith.addf %134, %136 : vector<16x64xf32>
    %138 = vector.extract_strided_slice %137 {offsets = [0, 0], sizes = [16, 32], strides = [1, 1]} : vector<16x64xf32> to vector<16x32xf32>
    %139 = vector.extract_strided_slice %137 {offsets = [0, 32], sizes = [16, 32], strides = [1, 1]} : vector<16x64xf32> to vector<16x32xf32>
    %140 = arith.truncf %132 : vector<16x32xf32> to vector<16x32xbf16>
    %141 = arith.truncf %138 : vector<16x32xf32> to vector<16x32xbf16>
    %142 = arith.truncf %139 : vector<16x32xf32> to vector<16x32xbf16>
    %143 = vector.extract_strided_slice %140 {offsets = [0, 0], sizes = [16, 8], strides = [1, 1]} : vector<16x32xbf16> to vector<16x8xbf16>
    %144 = vector.shape_cast %143 : vector<16x8xbf16> to vector<2x8x8xbf16>
    %145 = vector.extract_strided_slice %141 {offsets = [0, 0], sizes = [16, 8], strides = [1, 1]} : vector<16x32xbf16> to vector<16x8xbf16>
    %146 = vector.shape_cast %145 : vector<16x8xbf16> to vector<2x8x8xbf16>
    %147 = vector.extract_strided_slice %142 {offsets = [0, 0], sizes = [16, 8], strides = [1, 1]} : vector<16x32xbf16> to vector<16x8xbf16>
    %148 = vector.shape_cast %147 : vector<16x8xbf16> to vector<2x8x8xbf16>
    "tpu.trace_start"() <{level = 10 : i32, message = "bqd,bkd->bqk"}> : () -> ()
    %cst_37 = arith.constant dense<0.000000e+00> : vector<2x8x8xf32>
    %149 = tpu.matmul %144, %146, %cst_37 {dimension_numbers = #tpu.dot_dimension_numbers<[2], [2], [1], [1], [0, 0, 0, 1, 1, 1], [0], [0]>} : vector<2x8x8xbf16>, vector<2x8x8xbf16>, vector<2x8x8xf32> -> vector<2x8x8xf32>
    "tpu.trace_stop"() : () -> ()
    %cst_38 = arith.constant dense<0xFF800000> : vector<2x8xf32>
    %150 = vector.multi_reduction <maximumf>, %149, %cst_38 [2] : vector<2x8x8xf32> to vector<2x8xf32>
    %151 = vector.shape_cast %150 : vector<2x8xf32> to vector<2x8x1xf32>
    %152 = vector.broadcast %151 : vector<2x8x1xf32> to vector<2x8x8xf32>
    %153 = arith.subf %149, %152 : vector<2x8x8xf32>
    %154 = math.exp %153 : vector<2x8x8xf32>
    %cst_39 = arith.constant dense<0.000000e+00> : vector<2x8xf32>
    %155 = vector.multi_reduction <add>, %154, %cst_39 [2] : vector<2x8x8xf32> to vector<2x8xf32>
    %156 = vector.shape_cast %155 : vector<2x8xf32> to vector<2x8x1xf32>
    %157 = tpu.reciprocal %156 {approx = true} : vector<2x8x1xf32> -> vector<2x8x1xf32>
    %158 = vector.broadcast %157 : vector<2x8x1xf32> to vector<2x8x8xf32>
    %159 = arith.mulf %154, %158 : vector<2x8x8xf32>
    %160 = arith.truncf %159 : vector<2x8x8xf32> to vector<2x8x8xbf16>
    "tpu.trace_start"() <{level = 10 : i32, message = "bqk,bkd->bqd"}> : () -> ()
    %cst_40 = arith.constant dense<0.000000e+00> : vector<2x8x8xf32>
    %161 = tpu.matmul %160, %148, %cst_40 {dimension_numbers = #tpu.dot_dimension_numbers<[2], [1], [1], [2], [0, 0, 0, 1, 1, 2], [0], [0]>} : vector<2x8x8xbf16>, vector<2x8x8xbf16>, vector<2x8x8xf32> -> vector<2x8x8xf32>
    "tpu.trace_stop"() : () -> ()
    %162 = vector.shape_cast %161 : vector<2x8x8xf32> to vector<16x8xf32>
    %163 = vector.extract_strided_slice %140 {offsets = [0, 8], sizes = [16, 8], strides = [1, 1]} : vector<16x32xbf16> to vector<16x8xbf16>
    %164 = vector.shape_cast %163 : vector<16x8xbf16> to vector<2x8x8xbf16>
    %165 = vector.extract_strided_slice %141 {offsets = [0, 8], sizes = [16, 8], strides = [1, 1]} : vector<16x32xbf16> to vector<16x8xbf16>
    %166 = vector.shape_cast %165 : vector<16x8xbf16> to vector<2x8x8xbf16>
    %167 = vector.extract_strided_slice %142 {offsets = [0, 8], sizes = [16, 8], strides = [1, 1]} : vector<16x32xbf16> to vector<16x8xbf16>
    %168 = vector.shape_cast %167 : vector<16x8xbf16> to vector<2x8x8xbf16>
    "tpu.trace_start"() <{level = 10 : i32, message = "bqd,bkd->bqk"}> : () -> ()
    %cst_41 = arith.constant dense<0.000000e+00> : vector<2x8x8xf32>
    %169 = tpu.matmul %164, %166, %cst_41 {dimension_numbers = #tpu.dot_dimension_numbers<[2], [2], [1], [1], [0, 0, 0, 1, 1, 1], [0], [0]>} : vector<2x8x8xbf16>, vector<2x8x8xbf16>, vector<2x8x8xf32> -> vector<2x8x8xf32>
    "tpu.trace_stop"() : () -> ()
    %cst_42 = arith.constant dense<0xFF800000> : vector<2x8xf32>
    %170 = vector.multi_reduction <maximumf>, %169, %cst_42 [2] : vector<2x8x8xf32> to vector<2x8xf32>
    %171 = vector.shape_cast %170 : vector<2x8xf32> to vector<2x8x1xf32>
    %172 = vector.broadcast %171 : vector<2x8x1xf32> to vector<2x8x8xf32>
    %173 = arith.subf %169, %172 : vector<2x8x8xf32>
    %174 = math.exp %173 : vector<2x8x8xf32>
    %cst_43 = arith.constant dense<0.000000e+00> : vector<2x8xf32>
    %175 = vector.multi_reduction <add>, %174, %cst_43 [2] : vector<2x8x8xf32> to vector<2x8xf32>
    %176 = vector.shape_cast %175 : vector<2x8xf32> to vector<2x8x1xf32>
    %177 = tpu.reciprocal %176 {approx = true} : vector<2x8x1xf32> -> vector<2x8x1xf32>
    %178 = vector.broadcast %177 : vector<2x8x1xf32> to vector<2x8x8xf32>
    %179 = arith.mulf %174, %178 : vector<2x8x8xf32>
    %180 = arith.truncf %179 : vector<2x8x8xf32> to vector<2x8x8xbf16>
    "tpu.trace_start"() <{level = 10 : i32, message = "bqk,bkd->bqd"}> : () -> ()
    %cst_44 = arith.constant dense<0.000000e+00> : vector<2x8x8xf32>
    %181 = tpu.matmul %180, %168, %cst_44 {dimension_numbers = #tpu.dot_dimension_numbers<[2], [1], [1], [2], [0, 0, 0, 1, 1, 2], [0], [0]>} : vector<2x8x8xbf16>, vector<2x8x8xbf16>, vector<2x8x8xf32> -> vector<2x8x8xf32>
    "tpu.trace_stop"() : () -> ()
    %182 = vector.shape_cast %181 : vector<2x8x8xf32> to vector<16x8xf32>
    %183 = vector.extract_strided_slice %140 {offsets = [0, 16], sizes = [16, 8], strides = [1, 1]} : vector<16x32xbf16> to vector<16x8xbf16>
    %184 = vector.shape_cast %183 : vector<16x8xbf16> to vector<2x8x8xbf16>
    %185 = vector.extract_strided_slice %141 {offsets = [0, 16], sizes = [16, 8], strides = [1, 1]} : vector<16x32xbf16> to vector<16x8xbf16>
    %186 = vector.shape_cast %185 : vector<16x8xbf16> to vector<2x8x8xbf16>
    %187 = vector.extract_strided_slice %142 {offsets = [0, 16], sizes = [16, 8], strides = [1, 1]} : vector<16x32xbf16> to vector<16x8xbf16>
    %188 = vector.shape_cast %187 : vector<16x8xbf16> to vector<2x8x8xbf16>
    "tpu.trace_start"() <{level = 10 : i32, message = "bqd,bkd->bqk"}> : () -> ()
    %cst_45 = arith.constant dense<0.000000e+00> : vector<2x8x8xf32>
    %189 = tpu.matmul %184, %186, %cst_45 {dimension_numbers = #tpu.dot_dimension_numbers<[2], [2], [1], [1], [0, 0, 0, 1, 1, 1], [0], [0]>} : vector<2x8x8xbf16>, vector<2x8x8xbf16>, vector<2x8x8xf32> -> vector<2x8x8xf32>
    "tpu.trace_stop"() : () -> ()
    %cst_46 = arith.constant dense<0xFF800000> : vector<2x8xf32>
    %190 = vector.multi_reduction <maximumf>, %189, %cst_46 [2] : vector<2x8x8xf32> to vector<2x8xf32>
    %191 = vector.shape_cast %190 : vector<2x8xf32> to vector<2x8x1xf32>
    %192 = vector.broadcast %191 : vector<2x8x1xf32> to vector<2x8x8xf32>
    %193 = arith.subf %189, %192 : vector<2x8x8xf32>
    %194 = math.exp %193 : vector<2x8x8xf32>
    %cst_47 = arith.constant dense<0.000000e+00> : vector<2x8xf32>
    %195 = vector.multi_reduction <add>, %194, %cst_47 [2] : vector<2x8x8xf32> to vector<2x8xf32>
    %196 = vector.shape_cast %195 : vector<2x8xf32> to vector<2x8x1xf32>
    %197 = tpu.reciprocal %196 {approx = true} : vector<2x8x1xf32> -> vector<2x8x1xf32>
    %198 = vector.broadcast %197 : vector<2x8x1xf32> to vector<2x8x8xf32>
    %199 = arith.mulf %194, %198 : vector<2x8x8xf32>
    %200 = arith.truncf %199 : vector<2x8x8xf32> to vector<2x8x8xbf16>
    "tpu.trace_start"() <{level = 10 : i32, message = "bqk,bkd->bqd"}> : () -> ()
    %cst_48 = arith.constant dense<0.000000e+00> : vector<2x8x8xf32>
    %201 = tpu.matmul %200, %188, %cst_48 {dimension_numbers = #tpu.dot_dimension_numbers<[2], [1], [1], [2], [0, 0, 0, 1, 1, 2], [0], [0]>} : vector<2x8x8xbf16>, vector<2x8x8xbf16>, vector<2x8x8xf32> -> vector<2x8x8xf32>
    "tpu.trace_stop"() : () -> ()
    %202 = vector.shape_cast %201 : vector<2x8x8xf32> to vector<16x8xf32>
    %203 = vector.extract_strided_slice %140 {offsets = [0, 24], sizes = [16, 8], strides = [1, 1]} : vector<16x32xbf16> to vector<16x8xbf16>
    %204 = vector.shape_cast %203 : vector<16x8xbf16> to vector<2x8x8xbf16>
    %205 = vector.extract_strided_slice %141 {offsets = [0, 24], sizes = [16, 8], strides = [1, 1]} : vector<16x32xbf16> to vector<16x8xbf16>
    %206 = vector.shape_cast %205 : vector<16x8xbf16> to vector<2x8x8xbf16>
    %207 = vector.extract_strided_slice %142 {offsets = [0, 24], sizes = [16, 8], strides = [1, 1]} : vector<16x32xbf16> to vector<16x8xbf16>
    %208 = vector.shape_cast %207 : vector<16x8xbf16> to vector<2x8x8xbf16>
    "tpu.trace_start"() <{level = 10 : i32, message = "bqd,bkd->bqk"}> : () -> ()
    %cst_49 = arith.constant dense<0.000000e+00> : vector<2x8x8xf32>
    %209 = tpu.matmul %204, %206, %cst_49 {dimension_numbers = #tpu.dot_dimension_numbers<[2], [2], [1], [1], [0, 0, 0, 1, 1, 1], [0], [0]>} : vector<2x8x8xbf16>, vector<2x8x8xbf16>, vector<2x8x8xf32> -> vector<2x8x8xf32>
    "tpu.trace_stop"() : () -> ()
    %cst_50 = arith.constant dense<0xFF800000> : vector<2x8xf32>
    %210 = vector.multi_reduction <maximumf>, %209, %cst_50 [2] : vector<2x8x8xf32> to vector<2x8xf32>
    %211 = vector.shape_cast %210 : vector<2x8xf32> to vector<2x8x1xf32>
    %212 = vector.broadcast %211 : vector<2x8x1xf32> to vector<2x8x8xf32>
    %213 = arith.subf %209, %212 : vector<2x8x8xf32>
    %214 = math.exp %213 : vector<2x8x8xf32>
    %cst_51 = arith.constant dense<0.000000e+00> : vector<2x8xf32>
    %215 = vector.multi_reduction <add>, %214, %cst_51 [2] : vector<2x8x8xf32> to vector<2x8xf32>
    %216 = vector.shape_cast %215 : vector<2x8xf32> to vector<2x8x1xf32>
    %217 = tpu.reciprocal %216 {approx = true} : vector<2x8x1xf32> -> vector<2x8x1xf32>
    %218 = vector.broadcast %217 : vector<2x8x1xf32> to vector<2x8x8xf32>
    %219 = arith.mulf %214, %218 : vector<2x8x8xf32>
    %220 = arith.truncf %219 : vector<2x8x8xf32> to vector<2x8x8xbf16>
    "tpu.trace_start"() <{level = 10 : i32, message = "bqk,bkd->bqd"}> : () -> ()
    %cst_52 = arith.constant dense<0.000000e+00> : vector<2x8x8xf32>
    %221 = tpu.matmul %220, %208, %cst_52 {dimension_numbers = #tpu.dot_dimension_numbers<[2], [1], [1], [2], [0, 0, 0, 1, 1, 2], [0], [0]>} : vector<2x8x8xbf16>, vector<2x8x8xbf16>, vector<2x8x8xf32> -> vector<2x8x8xf32>
    "tpu.trace_stop"() : () -> ()
    %222 = vector.shape_cast %221 : vector<2x8x8xf32> to vector<16x8xf32>
    %223 = tpu.concatenate %162, %182, %202, %222 in 1 : vector<16x8xf32>, vector<16x8xf32>, vector<16x8xf32>, vector<16x8xf32> -> vector<16x32xf32>
    %224 = arith.truncf %223 : vector<16x32xf32> to vector<16x32xbf16>
    %c0_53 = arith.constant 0 : index
    %c0_54 = arith.constant 0 : index
    %225 = vector.load %arg7[%c0_53, %c0_54] : memref<32x32xbf16, #tpu.memory_space<vmem>>, vector<32x32xbf16>
    %cst_55 = arith.constant dense<0.000000e+00> : vector<16x32xf32>
    %226 = tpu.matmul %224, %225, %cst_55 {dimension_numbers = #tpu.dot_dimension_numbers<[1], [0], [0], [1], [0, 0, 1, 1], [], []>} : vector<16x32xbf16>, vector<32x32xbf16>, vector<16x32xf32> -> vector<16x32xf32>
    %227 = vector.extract_strided_slice %2 {offsets = [4, 0], sizes = [1, 32], strides = [1, 1]} : vector<16x128xf32> to vector<1x32xf32>
    %228 = vector.broadcast %227 : vector<1x32xf32> to vector<16x32xf32>
    %229 = arith.addf %226, %228 : vector<16x32xf32>
    %230 = arith.addf %126, %229 : vector<16x32xf32>
    %231 = vector.extract_strided_slice %2 {offsets = [9, 0], sizes = [1, 32], strides = [1, 1]} : vector<16x128xf32> to vector<1x32xf32>
    %232 = vector.extract_strided_slice %2 {offsets = [10, 0], sizes = [1, 32], strides = [1, 1]} : vector<16x128xf32> to vector<1x32xf32>
    %cst_56 = arith.constant dense<0.000000e+00> : vector<16xf32>
    %233 = vector.multi_reduction <add>, %230, %cst_56 [1] : vector<16x32xf32> to vector<16xf32>
    %234 = vector.shape_cast %233 : vector<16xf32> to vector<16x1xf32>
    %cst_57 = arith.constant 3.200000e+01 : f32
    %235 = vector.broadcast %cst_57 : f32 to vector<16x1xf32>
    %236 = arith.divf %234, %235 : vector<16x1xf32>
    %237 = arith.mulf %230, %230 : vector<16x32xf32>
    %cst_58 = arith.constant dense<0.000000e+00> : vector<16xf32>
    %238 = vector.multi_reduction <add>, %237, %cst_58 [1] : vector<16x32xf32> to vector<16xf32>
    %239 = vector.shape_cast %238 : vector<16xf32> to vector<16x1xf32>
    %cst_59 = arith.constant 3.200000e+01 : f32
    %240 = vector.broadcast %cst_59 : f32 to vector<16x1xf32>
    %241 = arith.divf %239, %240 : vector<16x1xf32>
    %242 = arith.mulf %236, %236 : vector<16x1xf32>
    %243 = arith.subf %241, %242 : vector<16x1xf32>
    %244 = vector.broadcast %236 : vector<16x1xf32> to vector<16x32xf32>
    %245 = arith.subf %230, %244 : vector<16x32xf32>
    %cst_60 = arith.constant 9.99999974E-6 : f32
    %246 = vector.broadcast %cst_60 : f32 to vector<16x1xf32>
    %247 = arith.addf %243, %246 : vector<16x1xf32>
    %248 = math.rsqrt %247 : vector<16x1xf32>
    %249 = vector.broadcast %231 : vector<1x32xf32> to vector<16x32xf32>
    %250 = vector.broadcast %248 : vector<16x1xf32> to vector<16x32xf32>
    %251 = arith.mulf %249, %250 : vector<16x32xf32>
    %252 = arith.mulf %245, %251 : vector<16x32xf32>
    %253 = vector.broadcast %232 : vector<1x32xf32> to vector<16x32xf32>
    %254 = arith.addf %252, %253 : vector<16x32xf32>
    %255 = arith.truncf %254 : vector<16x32xf32> to vector<16x32xbf16>
    %c0_61 = arith.constant 0 : index
    %c0_62 = arith.constant 0 : index
    %256 = vector.load %arg8[%c0_61, %c0_62] : memref<32x64xbf16, #tpu.memory_space<vmem>>, vector<32x64xbf16>
    %cst_63 = arith.constant dense<0.000000e+00> : vector<16x64xf32>
    %257 = tpu.matmul %255, %256, %cst_63 {dimension_numbers = #tpu.dot_dimension_numbers<[1], [0], [0], [1], [0, 0, 1, 1], [], []>} : vector<16x32xbf16>, vector<32x64xbf16>, vector<16x64xf32> -> vector<16x64xf32>
    %258 = vector.extract_strided_slice %2 {offsets = [5, 0], sizes = [1, 64], strides = [1, 1]} : vector<16x128xf32> to vector<1x64xf32>
    %259 = vector.broadcast %258 : vector<1x64xf32> to vector<16x64xf32>
    %260 = arith.addf %257, %259 : vector<16x64xf32>
    %cst_64 = arith.constant 0.000000e+00 : f32
    %261 = vector.broadcast %cst_64 : f32 to vector<16x64xf32>
    %262 = arith.maximumf %260, %261 : vector<16x64xf32>
    %263 = arith.truncf %262 : vector<16x64xf32> to vector<16x64xbf16>
    %c0_65 = arith.constant 0 : index
    %c0_66 = arith.constant 0 : index
    %264 = vector.load %arg9[%c0_65, %c0_66] : memref<64x32xbf16, #tpu.memory_space<vmem>>, vector<64x32xbf16>
    %cst_67 = arith.constant dense<0.000000e+00> : vector<16x32xf32>
    %265 = tpu.matmul %263, %264, %cst_67 {dimension_numbers = #tpu.dot_dimension_numbers<[1], [0], [0], [1], [0, 0, 1, 1], [], []>} : vector<16x64xbf16>, vector<64x32xbf16>, vector<16x32xf32> -> vector<16x32xf32>
    %266 = vector.extract_strided_slice %2 {offsets = [6, 0], sizes = [1, 32], strides = [1, 1]} : vector<16x128xf32> to vector<1x32xf32>
    %267 = vector.broadcast %266 : vector<1x32xf32> to vector<16x32xf32>
    %268 = arith.addf %265, %267 : vector<16x32xf32>
    %269 = arith.addf %254, %268 : vector<16x32xf32>
    %270 = vector.extract_strided_slice %2 {offsets = [11, 0], sizes = [1, 32], strides = [1, 1]} : vector<16x128xf32> to vector<1x32xf32>
    %271 = vector.extract_strided_slice %2 {offsets = [12, 0], sizes = [1, 32], strides = [1, 1]} : vector<16x128xf32> to vector<1x32xf32>
    %cst_68 = arith.constant dense<0.000000e+00> : vector<16xf32>
    %272 = vector.multi_reduction <add>, %269, %cst_68 [1] : vector<16x32xf32> to vector<16xf32>
    %273 = vector.shape_cast %272 : vector<16xf32> to vector<16x1xf32>
    %cst_69 = arith.constant 3.200000e+01 : f32
    %274 = vector.broadcast %cst_69 : f32 to vector<16x1xf32>
    %275 = arith.divf %273, %274 : vector<16x1xf32>
    %276 = arith.mulf %269, %269 : vector<16x32xf32>
    %cst_70 = arith.constant dense<0.000000e+00> : vector<16xf32>
    %277 = vector.multi_reduction <add>, %276, %cst_70 [1] : vector<16x32xf32> to vector<16xf32>
    %278 = vector.shape_cast %277 : vector<16xf32> to vector<16x1xf32>
    %cst_71 = arith.constant 3.200000e+01 : f32
    %279 = vector.broadcast %cst_71 : f32 to vector<16x1xf32>
    %280 = arith.divf %278, %279 : vector<16x1xf32>
    %281 = arith.mulf %275, %275 : vector<16x1xf32>
    %282 = arith.subf %280, %281 : vector<16x1xf32>
    %283 = vector.broadcast %275 : vector<16x1xf32> to vector<16x32xf32>
    %284 = arith.subf %269, %283 : vector<16x32xf32>
    %cst_72 = arith.constant 9.99999974E-6 : f32
    %285 = vector.broadcast %cst_72 : f32 to vector<16x1xf32>
    %286 = arith.addf %282, %285 : vector<16x1xf32>
    %287 = math.rsqrt %286 : vector<16x1xf32>
    %288 = vector.broadcast %270 : vector<1x32xf32> to vector<16x32xf32>
    %289 = vector.broadcast %287 : vector<16x1xf32> to vector<16x32xf32>
    %290 = arith.mulf %288, %289 : vector<16x32xf32>
    %291 = arith.mulf %284, %290 : vector<16x32xf32>
    %292 = vector.broadcast %271 : vector<1x32xf32> to vector<16x32xf32>
    %293 = arith.addf %291, %292 : vector<16x32xf32>
    %294 = arith.truncf %293 : vector<16x32xf32> to vector<16x32xbf16>
    %c0_73 = arith.constant 0 : index
    %c0_74 = arith.constant 0 : index
    %295 = vector.load %arg11[%c0_73, %c0_74] : memref<16x32xbf16, #tpu.memory_space<vmem>>, vector<16x32xbf16>
    tpu.vector_store %arg11[%c0_73, %c0_74], %294 {strides = array<i32>} : memref<16x32xbf16, #tpu.memory_space<vmem>>, vector<16x32xbf16>,
    return
  }
  func.func @transform_0(%arg0: i32) -> (i32, i32) {
    %c0_i32 = arith.constant 0 : i32
    %c0_i32_0 = arith.constant 0 : i32
    return %arg0, %c0_i32 : i32, i32
  }
  func.func @transform_1(%arg0: i32) -> (i32, i32) {
    %c0_i32 = arith.constant 0 : i32
    %c0_i32_0 = arith.constant 0 : i32
    return %arg0, %c0_i32 : i32, i32
  }
  func.func @transform_2(%arg0: i32) -> (i32, i32) {
    %c0_i32 = arith.constant 0 : i32
    %c0_i32_0 = arith.constant 0 : i32
    %c0_i32_1 = arith.constant 0 : i32
    return %c0_i32, %c0_i32_0 : i32, i32
  }
  func.func @transform_3(%arg0: i32) -> (i32, i32) {
    %c0_i32 = arith.constant 0 : i32
    %c0_i32_0 = arith.constant 0 : i32
    %c0_i32_1 = arith.constant 0 : i32
    return %c0_i32, %c0_i32_0 : i32, i32
  }
  func.func @transform_4(%arg0: i32) -> (i32, i32) {
    %c0_i32 = arith.constant 0 : i32
    %c0_i32_0 = arith.constant 0 : i32
    %c0_i32_1 = arith.constant 0 : i32
    return %c0_i32, %c0_i32_0 : i32, i32
  }
  func.func @transform_5(%arg0: i32) -> (i32, i32) {
    %c0_i32 = arith.constant 0 : i32
    %c0_i32_0 = arith.constant 0 : i32
    %c0_i32_1 = arith.constant 0 : i32
    return %c0_i32, %c0_i32_0 : i32, i32
  }
  func.func @transform_6(%arg0: i32) -> (i32, i32) {
    %c0_i32 = arith.constant 0 : i32
    %c0_i32_0 = arith.constant 0 : i32
    %c0_i32_1 = arith.constant 0 : i32
    return %c0_i32, %c0_i32_0 : i32, i32
  }
  func.func @transform_7(%arg0: i32) -> (i32, i32) {
    %c0_i32 = arith.constant 0 : i32
    %c0_i32_0 = arith.constant 0 : i32
    %c0_i32_1 = arith.constant 0 : i32
    return %c0_i32, %c0_i32_0 : i32, i32
  }
  func.func @transform_8(%arg0: i32) -> (i32, i32) {
    %c0_i32 = arith.constant 0 : i32
    %c0_i32_0 = arith.constant 0 : i32
    %c0_i32_1 = arith.constant 0 : i32
    return %c0_i32, %c0_i32_0 : i32, i32
  }
  func.func @transform_9(%arg0: i32) -> (i32, i32) {
    %c0_i32 = arith.constant 0 : i32
    %c0_i32_0 = arith.constant 0 : i32
    %c0_i32_1 = arith.constant 0 : i32
    return %c0_i32, %c0_i32_0 : i32, i32
  }
  func.func @transform_10(%arg0: i32) -> (i32, i32) {
    %c0_i32 = arith.constant 0 : i32
    %c0_i32_0 = arith.constant 0 : i32
    return %arg0, %c0_i32 : i32, i32
  }
}

</mosaic_0001>

<bundles_post_ra>
// kernel: tpu_custom_call.1
= control target key start
LH: loop header
LB: loop body
LE: loop exit
PB: predicated region body
PF: predicated region fallthrough
CT: control target
= control target key end

     0   :  { %15 = vsyncpa [#allocation3], 0  ;;  %s3957_s0 = inlined_call_operand.hbm [shape: bf16[16,32], index: 0, kind: input, shape index: {}]   ;;  %s3958_s1 = inlined_call_operand.hbm [shape: bf16[16,32], index: 1, kind: input, shape index: {}]   ;;  %s3959_s2 = inlined_call_operand.vmem [shape: bf16[32,96], index: 2, kind: input, shape index: {}]   ;;  %s3960_s3 = inlined_call_operand.vmem [shape: bf16[32,32], index: 3, kind: input, shape index: {}]   ;;  %s3961_s4 = inlined_call_operand.vmem [shape: bf16[32,32], index: 4, kind: input, shape index: {}]   ;;  %s3962_s5 = inlined_call_operand.hbm [shape: bf16[32,64], index: 5, kind: input, shape index: {}]   ;;  %s3963_s6 = inlined_call_operand.hbm [shape: bf16[32,32], index: 6, kind: input, shape index: {}]   ;;  %s3964_s7 = inlined_call_operand.hbm [shape: bf16[32,64], index: 7, kind: input, shape index: {}]   ;;  %s3965_s8 = inlined_call_operand.vmem [shape: bf16[64,32], index: 8, kind: input, shape index: {}]   ;;  %s3966_s9 = inlined_call_operand.vmem [shape: f32[16,128], index: 9, kind: input, shape index: {}]   ;;  %s3967_s10 = inlined_call_operand.hbm [shape: bf16[16,32], index: 10, kind: output, shape index: {}]  }
   0x1   :  { %16 = vsyncpa [#allocation6], 0 }
   0x2   :  { %17 = vsyncpa [#allocation9], 0 }
   0x3   :  { %18 = vsyncpa [#allocation4], 0  ;;  %s3290_s13 = smov [#allocation5]   ;;  %s3291_s15 = smov [#allocation8]  }
   0x4   :  { %s36_s14 = sshll.u32 %s3290_s13, 4  ;;  %s66_s16 = sshll.u32 %s3291_s15, 4  ;;  %s37_s14 = int_to_ptr.vmem [resolvable:$true] %s36_s14  ;;  %s3368_s16 = int_to_ptr.vmem [resolvable:$true] %s66_s16 }
   0x5   :  { %s3150_s19 = scalar_lea.hbm %s3958_s1, 128 }
   0x6   :  { %p3151_p0 = scmp.ne.s32.totalorder %s3958_s1, %s3150_s19  ;;  %p3154_p1 = scmp.lt.u32.totalorder %s3150_s19, %s3958_s1 }
   0x8   :  { %p3156_p2 = pnand %p3154_p1, %p3151_p0 }
   0xa   :  { %3159 = shalt.err (!%p3156_p2)
}
   0xb   :  { %s3160_s24 = scalar_lea.vmem %s37_s14, 128  ;;  %p3165_p4 = scmp.lt.s32.totalorder %s37_s14, %s37_s14 }
   0xc   :  { %p3161_p3 = scmp.ne.s32.totalorder %s37_s14, %s3160_s24  ;;  %p3166_p5 = scmp.lt.s32.totalorder %s3160_s24, %s3160_s24 }
   0xe   :  { %p3167_p6 = por %p3166_p5, %p3165_p4 }
  0x10   :  { %p3168_p7 = pnand %p3167_p6, %p3161_p3 }
  0x12   :  { %3171 = shalt.err (!%p3168_p7)
}
  0x13   :  { %s3292_s25 = smov 64   ;;  %s3293_s26 = smov 4  }
  0x14   :  { %42 = dma.hbm_to_vmem [thread:$0]  %s3958_s1, 128, %s37_s14, [#allocation6], %s3292_s25, %s3292_s25, %s3293_s26  }
  0x15   :  { %s3172_s11 = scalar_lea.hbm %s3963_s6, 256 }
  0x16   :  { %p3173_p8 = scmp.ne.s32.totalorder %s3963_s6, %s3172_s11  ;;  %p3176_p9 = scmp.lt.u32.totalorder %s3172_s11, %s3963_s6 }
  0x18   :  { %p3178_p10 = pnand %p3176_p9, %p3173_p8 }
  0x1a   :  { %3181 = shalt.err (!%p3178_p10)
}
  0x1b   :  { %s3182_s18 = scalar_lea.vmem %s3368_s16, 256  ;;  %p3187_p12 = scmp.lt.s32.totalorder %s3368_s16, %s3368_s16 }
  0x1c   :  { %p3183_p11 = scmp.ne.s32.totalorder %s3368_s16, %s3182_s18  ;;  %p3188_p13 = scmp.lt.s32.totalorder %s3182_s18, %s3182_s18 }
  0x1e   :  { %p3189_p0 = por %p3188_p13, %p3187_p12 }
  0x20   :  { %p3190_p1 = pnand %p3189_p0, %p3183_p11 }
  0x22   :  { %3193 = shalt.err (!%p3190_p1)
}
  0x23   :  { %72 = dma.hbm_to_vmem [thread:$0]  %s3963_s6, 256, %s3368_s16, [#allocation9], %s3292_s25, %s3292_s25, %s3293_s26  }
  0x24   :  { %s3294_s19 = smov [#allocation2]   ;;  %s3295_s21 = smov [#allocation7]  }
  0x25   :  { %s24_s20 = sshll.u32 %s3294_s19, 4  ;;  %s54_s22 = sshll.u32 %s3295_s21, 4  ;;  %s25_s20 = int_to_ptr.vmem [resolvable:$true] %s24_s20  ;;  %s3405_s22 = int_to_ptr.vmem [resolvable:$true] %s54_s22 }
  0x26   :  { %s3194_s27 = scalar_lea.hbm %s3957_s0, 128 }
  0x27   :  { %p3195_p2 = scmp.ne.s32.totalorder %s3957_s0, %s3194_s27  ;;  %p3198_p3 = scmp.lt.u32.totalorder %s3194_s27, %s3957_s0 }
  0x29   :  { %p3200_p4 = pnand %p3198_p3, %p3195_p2 }
  0x2b   :  { %3203 = shalt.err (!%p3200_p4)
}
  0x2c   :  { %s3204_s6 = scalar_lea.vmem %s25_s20, 128  ;;  %p3209_p6 = scmp.lt.s32.totalorder %s25_s20, %s25_s20 }
  0x2d   :  { %p3205_p5 = scmp.ne.s32.totalorder %s25_s20, %s3204_s6  ;;  %p3210_p7 = scmp.lt.s32.totalorder %s3204_s6, %s3204_s6 }
  0x2f   :  { %p3211_p8 = por %p3210_p7, %p3209_p6 }
  0x31   :  { %p3212_p9 = pnand %p3211_p8, %p3205_p5 }
  0x33   :  { %3215 = shalt.err (!%p3212_p9)
}
  0x34   :  { %30 = dma.hbm_to_vmem [thread:$0]  %s3957_s0, 128, %s25_s20, [#allocation3], %s3292_s25, %s3292_s25, %s3293_s26  }
  0x35   :  { %s3216_s17 = scalar_lea.hbm %s3962_s5, 256 }
  0x36   :  { %p3217_p10 = scmp.ne.s32.totalorder %s3962_s5, %s3216_s17  ;;  %p3220_p11 = scmp.lt.u32.totalorder %s3216_s17, %s3962_s5 }
  0x38   :  { %p3222_p12 = pnand %p3220_p11, %p3217_p10 }
  0x3a   :  { %3225 = shalt.err (!%p3222_p12)
}
  0x3b   :  { %s3226_s21 = scalar_lea.vmem %s3405_s22, 256  ;;  %p3231_p0 = scmp.lt.s32.totalorder %s3405_s22, %s3405_s22 }
  0x3c   :  { %p3227_p13 = scmp.ne.s32.totalorder %s3405_s22, %s3226_s21  ;;  %p3232_p1 = scmp.lt.s32.totalorder %s3226_s21, %s3226_s21 }
  0x3e   :  { %p3233_p2 = por %p3232_p1, %p3231_p0 }
  0x40   :  { %p3234_p3 = pnand %p3233_p2, %p3227_p13 }
  0x42   :  { %3237 = shalt.err (!%p3234_p3)
}
  0x43   :  { %60 = dma.hbm_to_vmem [thread:$0]  %s3962_s5, 256, %s3405_s22, [#allocation6], %s3292_s25, %s3292_s25, %s3293_s26  }
  0x44   :  { %s3296_s23 = smov [#allocation10]   ;;  %s3238_s29 = scalar_lea.hbm %s3964_s7, 256 }
  0x45   :  { %s78_s24 = sshll.u32 %s3296_s23, 4  ;;  %p3239_p4 = scmp.ne.s32.totalorder %s3964_s7, %s3238_s29  ;;  %s79_s24 = int_to_ptr.vmem [resolvable:$true] %s78_s24 }
  0x46   :  { %p3242_p5 = scmp.lt.u32.totalorder %s3238_s29, %s3964_s7 }
  0x48   :  { %p3244_p6 = pnand %p3242_p5, %p3239_p4 }
  0x4a   :  { %3247 = shalt.err (!%p3244_p6)
}
  0x4b   :  { %s3248_s12 = scalar_lea.vmem %s79_s24, 256  ;;  %p3253_p8 = scmp.lt.s32.totalorder %s79_s24, %s79_s24 }
  0x4c   :  { %p3249_p7 = scmp.ne.s32.totalorder %s79_s24, %s3248_s12  ;;  %p3254_p9 = scmp.lt.s32.totalorder %s3248_s12, %s3248_s12 }
  0x4e   :  { %p3255_p10 = por %p3254_p9, %p3253_p8 }
  0x50   :  { %p3256_p11 = pnand %p3255_p10, %p3249_p7 }
  0x52   :  { %3259 = shalt.err (!%p3256_p11)
}
  0x53   :  { %84 = dma.hbm_to_vmem [thread:$0]  %s3964_s7, 256, %s79_s24, [#allocation9], %s3292_s25, %s3292_s25, %s3293_s26  }
  0x54   :  { %3282 = dma.done.wait [#allocation3], 128  }
  0x55   :  { %3283 = vsyncadd [#allocation3], 4294967168 }
  0x56   :  { %3284 = dma.done.wait [#allocation6], 384  }
  0x57   :  { %3285 = vsyncadd [#allocation6], 4294966912 }
  0x58   :  { %3286 = dma.done.wait [#allocation9], 512  }
  0x59   :  { %3287 = vsyncadd [#allocation9], 4294966784  ;;  %v3297_v0 = vmov 0.0   ;;  %vm3298_vm0 = vmmov 0   ;;  %v3054_v1 = vld [vmem:[%s3959_s2] sm:$0xff]   ;;  %v3055_v2 = vld [vmem:[%s3959_s2 + $0x8] sm:$0xff]   ;;  %v115_v4 = vlaneseq }
  0x5a   :  { %2749 = vmatprep.subr.bf16.mxu1 %v3297_v0  ;;  %2753 = vmatprep.mubr.msk.bf16.mxu1 %vm3298_vm0, %v3297_v0  ;;  %v3469_v3 = vld [vmem:[#allocation2] sm:$0xff]   ;;  %vm136_vm1 = vcmask 261120   ;;  %s3299_s1 = smov 96   ;;  %vm189_vm2 = vcmask 64512   ;;  %s3300_s14 = smov 88   ;;  %vm313_vm3 = vcmask 1043456  }
  0x5b   :  { %2763 = vmatprep.subr.bf16.mxu0 %v3297_v0  ;;  %2765 = vmatprep.mubr.msk.bf16.mxu0 %vm3298_vm0, %v3297_v0  ;;  %v3477_v5 = vshrl.u32 %v115_v4, 7  ;;  %v3483_v7 = vld [vmem:[%s3966_s9] sm:$0xff]  ;;  %s3301_s19 = smov 120   ;;  %s3302_s21 = smov 56   ;;  %vm1091_vm4 = vcmask 130048   ;;  %vm1094_vm5 = vcmask 195584  }
  0x5c   :  { %2750 = vmatpush3.bf16.msra.mxu1 %v3054_v1  ;;  %s3303_s0 = smov 80   ;;  %s3304_s20 = smov 112   ;;  %vm2470_vm6 = vcmask 523264   ;;  %vm2567_vm7 = vcmask 257024  }
  0x5d   :  { %2751 = vmatprep.subr.bf16.mxu1 %v3297_v0  ;;  %v117_v6 = vsub.s32 0, %v3477_v5  ;;  %s3305_s23 = smov 48   ;;  %s3306_s24 = smov 72  }
  0x5e   :  { %s3307_s27 = smov 104   ;;  %s3308_s28 = smov 40  }
  0x5f   :  { %v118_v8 = vrot.slane %v3483_v7, %v117_v6  ;;  %s3309_s29 = smov 8   ;;  %s3310_s30 = smov 16  }
  0x60   :  { %2752 = vmatpush3.bf16.msra.mxu1 %v3055_v2  ;;  %s3311_s5 = smov 24  }
  0x61   :  { %2757 = vmatprep.subr.bf16.mxu1 %v3297_v0 }
  0x63   :  { %2754 = vmatmul.mubr.msk.bf16.vlgmr.msra.gmra.mrb[0].mxu1 %vm136_vm1, %v3469_v3 }
  0x64   :  { %2759 = vmatprep.mubr.msk.bf16.mxu1 %vm3298_vm0, %v3297_v0 }
 0x136   :  { %v174_v9 = vpop.f32.mrb[0].mxu1 }
 0x137   :  { %v175_v10 = vadd.f32 %v174_v9, %v118_v8  ;;  %v2755_v11 = vpop.f32.mrb[1].mxu1 }
 0x138   :  { %v177_v12 = vpop.f32.mrb[2].mxu1 }
 0x139   :  { %v3488_v13 = vpack.c.bf16 %v175_v10, %v175_v10  ;;  %v178_v14 = vadd.f32 %v177_v12, %v118_v8  ;;  %v2756_v15 = vpop.f32.mrb[3].mxu1 }
 0x13b   :  { %187 = vrot.lane.b32.xlu0 %v3488_v13, %s3299_s1  ;;  %v3492_v16 = vpack.c.bf16 %v178_v14, %v178_v14 }
 0x13f   :  { %236 = vrot.lane.b32.xlu0 %v3492_v16, %s3299_s1 }
 0x1ad   :  { %v188_v17 = vpop.permute.xlu0 %187 }
 0x1ae   :  { %v194_v18 = vsel %vm189_vm2, %v188_v17, 0 }
 0x1af   :  { %2758 = vmatpush3.bf16.xpose.msra.mxu1 %v194_v18 }
 0x1b0   :  { %2769 = vmatprep.subr.bf16.mxu1 %v3297_v0 }
 0x1b1   :  { %v237_v19 = vpop.permute.xlu0 %236 }
 0x1b2   :  { %v242_v20 = vsel %vm189_vm2, %v237_v19, 0 }
 0x1b3   :  { %2764 = vmatpush3.bf16.xpose.msra.mxu0 %v242_v20 }
 0x1b4   :  { %2775 = vmatprep.subr.bf16.mxu0 %v3297_v0 }
 0x1b6   :  { %2760 = vmatmul.mubr.msk.bf16.vlgmr.msra.gmra.mrb[4].mxu1 %vm189_vm2, %v3488_v13 }
 0x1b7   :  { %2771 = vmatprep.mubr.msk.bf16.mxu1 %vm3298_vm0, %v3297_v0 }
 0x1ba   :  { %2766 = vmatmul.mubr.msk.bf16.vlgmr.msra.gmra.mrb[0].mxu0 %vm189_vm2, %v3492_v16 }
 0x1bb   :  { %2777 = vmatprep.mubr.msk.bf16.mxu0 %vm3298_vm0, %v3297_v0 }
 0x289   :  { %v230_v21 = vpop.f32.mrb[4].mxu1 }
 0x28a   :  { %v2761_v22 = vpop.f32.mrb[5].mxu1  ;;  %v284_v23 = vsel %vm189_vm2, %v230_v21, -inf }
 0x28b   :  { %285 = vmax.xlane.f32.xlu1 %v284_v23  ;;  %v233_v24 = vpop.f32.mrb[6].mxu1 }
 0x28c   :  { %v2762_v25 = vpop.f32.mrb[7].mxu1 }
 0x28d   :  { %v278_v26 = vpop.f32.mrb[0].mxu0 }
 0x28e   :  { %v2767_v27 = vpop.f32.mrb[1].mxu0  ;;  %v287_v28 = vsel %vm189_vm2, %v278_v26, -inf }
 0x28f   :  { %v281_v29 = vpop.f32.mrb[2].mxu0  ;;  %288 = vmax.xlane.f32.xlu1 %v287_v28 }
 0x290   :  { %v2768_v30 = vpop.f32.mrb[3].mxu0 }
 0x2a0   :  { %308 = vrot.lane.b32.xlu1 %v3488_v13, %s3292_s25 }
 0x2a4   :  { %357 = vrot.lane.b32.xlu1 %v3492_v16, %s3292_s25 }
 0x2a8   :  { %407 = vrot.lane.b32.xlu1 %v3488_v13, %s3300_s14 }
 0x318   :  { %v286_v31 = vpop.xlane.xlu1 %285 }
 0x319   :  { %v290_v32 = vsub.f32 %v230_v21, %v286_v31 }
 0x31b   :  { %v292_v33 = vmul.f32 1.442695, %v290_v32 }
 0x31c   :  { %v289_v34 = vpop.xlane.xlu1 %288 }
 0x31d   :  { %3073 = vpow2.f32 %v292_v33  ;;  %v291_v35 = vsub.f32 %v278_v26, %v289_v34 }
 0x31f   :  { %v294_v36 = vmul.f32 1.442695, %v291_v35 }
 0x320   :  { %v309_v37 = vpop.permute.xlu1 %308 }
 0x321   :  { %3075 = vpow2.f32 %v294_v36  ;;  %v315_v38 = vsel %vm313_vm3, %v309_v37, 0 }
 0x322   :  { %2770 = vmatpush3.bf16.msra.mxu1 %v315_v38 }
 0x323   :  { %2781 = vmatprep.subr.bf16.mxu1 %v3297_v0 }
 0x324   :  { %v358_v39 = vpop.permute.xlu1 %357 }
 0x325   :  { %v363_v40 = vsel %vm313_vm3, %v358_v39, 0 }
 0x326   :  { %2776 = vmatpush3.bf16.msra.mxu0 %v363_v40 }
 0x327   :  { %v3074_v41 = vpop.eup %3073  ;;  %2787 = vmatprep.subr.bf16.mxu0 %v3297_v0 }
 0x328   :  { %v296_v42 = vsel %vm189_vm2, %v3074_v41, 0.0  ;;  %v408_v45 = vpop.permute.xlu1 %407 }
 0x329   :  { %297 = vadd.xlane.f32.xlu0 %v296_v42  ;;  %v413_v52 = vsel %vm189_vm2, %v408_v45, 0 }
 0x32b   :  { %v3076_v43 = vpop.eup %3075 }
 0x32c   :  { %v299_v44 = vsel %vm189_vm2, %v3076_v43, 0.0 }
 0x32d   :  { %300 = vadd.xlane.f32.xlu1 %v299_v44 }
 0x33e   :  { %457 = vrot.lane.b32.xlu1 %v3492_v16, %s3300_s14 }
 0x33f   :  { %405 = vrot.lane.b32.xlu0 %v3488_v13, %s3301_s19 }
 0x342   :  { %455 = vrot.lane.b32.xlu1 %v3492_v16, %s3301_s19 }
 0x3b6   :  { %v298_v46 = vpop.xlane.xlu0 %297 }
 0x3b7   :  { %3077 = vrcp.f32 %v298_v46 }
 0x3ba   :  { %v301_v47 = vpop.xlane.xlu1 %300  ;;  %v406_v57 = vpop.permute.xlu0 %405 }
 0x3bb   :  { %3079 = vrcp.f32 %v301_v47 }
 0x3be   :  { %v458_v54 = vpop.permute.xlu1 %457 }
 0x3bf   :  { %v463_v56 = vsel %vm189_vm2, %v458_v54, 0 }
 0x3c1   :  { %v3078_v48 = vpop.eup %3077 }
 0x3c2   :  { %v304_v49 = vmul.f32 %v3078_v48, %v3074_v41  ;;  %v456_v58 = vpop.permute.xlu1 %455 }
 0x3c4   :  { %v306_v50 = vpack.c.bf16 %v304_v49, %v304_v49 }
 0x3c5   :  { %v3080_v51 = vpop.eup %3079 }
 0x3c6   :  { %v305_v53 = vmul.f32 %v3080_v51, %v3076_v43  ;;  %2772 = vmatmul.mubr.msk.bf16.vlgmr.msra.gmra.mrb[8].mxu1 %vm189_vm2, %v306_v50 }
 0x3c7   :  { %2782 = vmatpush3.bf16.xpose.msra.mxu1 %v413_v52  ;;  %2783 = vmatprep.mubr.msk.bf16.mxu1 %vm3298_vm0, %v3297_v0 }
 0x3c8   :  { %v307_v55 = vpack.c.bf16 %v305_v53, %v305_v53  ;;  %2793 = vmatprep.subr.bf16.mxu1 %v3297_v0 }
 0x3ca   :  { %2778 = vmatmul.mubr.msk.bf16.vlgmr.msra.gmra.mrb[4].mxu0 %vm189_vm2, %v307_v55 }
 0x3cb   :  { %2788 = vmatpush3.bf16.xpose.msra.mxu0 %v463_v56  ;;  %2789 = vmatprep.mubr.msk.bf16.mxu0 %vm3298_vm0, %v3297_v0 }
 0x3cc   :  { %2799 = vmatprep.subr.bf16.mxu0 %v3297_v0 }
 0x3ce   :  { %2784 = vmatmul.mubr.msk.bf16.vlgmr.msra.gmra.mrb[12].mxu1 %vm189_vm2, %v406_v57 }
 0x3cf   :  { %2795 = vmatprep.mubr.msk.bf16.mxu1 %vm3298_vm0, %v3297_v0 }
 0x3d2   :  { %2790 = vmatmul.mubr.msk.bf16.vlgmr.msra.gmra.mrb[8].mxu0 %vm189_vm2, %v456_v58 }
 0x3d3   :  { %2801 = vmatprep.mubr.msk.bf16.mxu0 %vm3298_vm0, %v3297_v0 }
 0x499   :  { %v3544_v59 = vpop.f32.mrb[8].mxu1 }
 0x49a   :  { %v2773_v60 = vpop.f32.mrb[9].mxu1 }
 0x49b   :  { %v354_v61 = vpop.f32.mrb[10].mxu1 }
 0x49c   :  { %v2774_v62 = vpop.f32.mrb[11].mxu1 }
 0x49d   :  { %v3546_v63 = vpop.f32.mrb[4].mxu0 }
 0x49e   :  { %v2779_v1 = vpop.f32.mrb[5].mxu0 }
 0x49f   :  { %v402_v2 = vpop.f32.mrb[6].mxu0 }
 0x4a0   :  { %v2780_v4 = vpop.f32.mrb[7].mxu0 }
 0x4a1   :  { %v449_v8 = vpop.f32.mrb[12].mxu1 }
 0x4a2   :  { %v2785_v9 = vpop.f32.mrb[13].mxu1  ;;  %v505_v10 = vsel %vm189_vm2, %v449_v8, -inf }
 0x4a3   :  { %506 = vmax.xlane.f32.xlu1 %v505_v10  ;;  %v452_v11 = vpop.f32.mrb[14].mxu1 }
 0x4a4   :  { %v2786_v12 = vpop.f32.mrb[15].mxu1 }
 0x4a5   :  { %v499_v14 = vpop.f32.mrb[8].mxu0 }
 0x4a6   :  { %v2791_v15 = vpop.f32.mrb[9].mxu0  ;;  %v508_v17 = vsel %vm189_vm2, %v499_v14, -inf }
 0x4a7   :  { %509 = vmax.xlane.f32.xlu0 %v508_v17  ;;  %v502_v18 = vpop.f32.mrb[10].mxu0 }
 0x4a8   :  { %v2792_v19 = vpop.f32.mrb[11].mxu0 }
 0x4b4   :  { %529 = vrot.lane.b32.xlu1 %v3488_v13, %s3302_s21 }
 0x4b8   :  { %627 = vrot.lane.b32.xlu1 %v3488_v13, %s3303_s0 }
 0x4bd   :  { %577 = vrot.lane.b32.xlu0 %v3492_v16, %s3302_s21 }
 0x4c1   :  { %625 = vrot.lane.b32.xlu0 %v3488_v13, %s3304_s20 }
 0x530   :  { %v507_v20 = vpop.xlane.xlu1 %506 }
 0x531   :  { %v511_v21 = vsub.f32 %v449_v8, %v507_v20 }
 0x533   :  { %v513_v22 = vmul.f32 1.442695, %v511_v21 }
 0x534   :  { %v510_v23 = vpop.xlane.xlu0 %509  ;;  %v530_v24 = vpop.permute.xlu1 %529 }
 0x535   :  { %3081 = vpow2.f32 %v513_v22  ;;  %v512_v25 = vsub.f32 %v499_v14, %v510_v23  ;;  %v535_v26 = vsel %vm313_vm3, %v530_v24, 0 }
 0x536   :  { %2794 = vmatpush3.bf16.msra.mxu1 %v535_v26 }
 0x537   :  { %v515_v27 = vmul.f32 1.442695, %v512_v25  ;;  %2805 = vmatprep.subr.bf16.mxu1 %v3297_v0 }
 0x538   :  { %v578_v28 = vpop.permute.xlu0 %577  ;;  %v628_v34 = vpop.permute.xlu1 %627 }
 0x539   :  { %3083 = vpow2.f32 %v515_v27  ;;  %v583_v29 = vsel %vm313_vm3, %v578_v28, 0  ;;  %v633_v41 = vsel %vm189_vm2, %v628_v34, 0 }
 0x53a   :  { %2800 = vmatpush3.bf16.msra.mxu0 %v583_v29 }
 0x53b   :  { %2811 = vmatprep.subr.bf16.mxu0 %v3297_v0 }
 0x53c   :  { %v626_v46 = vpop.permute.xlu0 %625 }
 0x53f   :  { %v3082_v30 = vpop.eup %3081 }
 0x540   :  { %v517_v31 = vsel %vm189_vm2, %v3082_v30, 0.0 }
 0x541   :  { %518 = vadd.xlane.f32.xlu1 %v517_v31 }
 0x543   :  { %v3084_v32 = vpop.eup %3083 }
 0x544   :  { %v520_v33 = vsel %vm189_vm2, %v3084_v32, 0.0 }
 0x545   :  { %521 = vadd.xlane.f32.xlu1 %v520_v33 }
 0x556   :  { %677 = vrot.lane.b32.xlu1 %v3492_v16, %s3303_s0 }
 0x55a   :  { %675 = vrot.lane.b32.xlu1 %v3492_v16, %s3304_s20 }
 0x5ce   :  { %v519_v35 = vpop.xlane.xlu1 %518 }
 0x5cf   :  { %3085 = vrcp.f32 %v519_v35 }
 0x5d2   :  { %v522_v36 = vpop.xlane.xlu1 %521 }
 0x5d3   :  { %3087 = vrcp.f32 %v522_v36 }
 0x5d6   :  { %v678_v43 = vpop.permute.xlu1 %677 }
 0x5d7   :  { %v683_v45 = vsel %vm189_vm2, %v678_v43, 0 }
 0x5d9   :  { %v3086_v37 = vpop.eup %3085 }
 0x5da   :  { %v525_v38 = vmul.f32 %v3086_v37, %v3082_v30  ;;  %v676_v47 = vpop.permute.xlu1 %675 }
 0x5dc   :  { %v527_v39 = vpack.c.bf16 %v525_v38, %v525_v38 }
 0x5dd   :  { %v3088_v40 = vpop.eup %3087 }
 0x5de   :  { %v526_v42 = vmul.f32 %v3088_v40, %v3084_v32  ;;  %2796 = vmatmul.mubr.msk.bf16.vlgmr.msra.gmra.mrb[16].mxu1 %vm189_vm2, %v527_v39 }
 0x5df   :  { %2806 = vmatpush3.bf16.xpose.msra.mxu1 %v633_v41  ;;  %2807 = vmatprep.mubr.msk.bf16.mxu1 %vm3298_vm0, %v3297_v0 }
 0x5e0   :  { %v528_v44 = vpack.c.bf16 %v526_v42, %v526_v42  ;;  %2817 = vmatprep.subr.bf16.mxu1 %v3297_v0 }
 0x5e2   :  { %2802 = vmatmul.mubr.msk.bf16.vlgmr.msra.gmra.mrb[12].mxu0 %vm189_vm2, %v528_v44 }
 0x5e3   :  { %2812 = vmatpush3.bf16.xpose.msra.mxu0 %v683_v45  ;;  %2813 = vmatprep.mubr.msk.bf16.mxu0 %vm3298_vm0, %v3297_v0 }
 0x5e4   :  { %2823 = vmatprep.subr.bf16.mxu0 %v3297_v0 }
 0x5e6   :  { %2808 = vmatmul.mubr.msk.bf16.vlgmr.msra.gmra.mrb[20].mxu1 %vm189_vm2, %v626_v46 }
 0x5e7   :  { %2819 = vmatprep.mubr.msk.bf16.mxu1 %vm3298_vm0, %v3297_v0 }
 0x5ea   :  { %2814 = vmatmul.mubr.msk.bf16.vlgmr.msra.gmra.mrb[16].mxu0 %vm189_vm2, %v676_v47 }
 0x5eb   :  { %2825 = vmatprep.mubr.msk.bf16.mxu0 %vm3298_vm0, %v3297_v0 }
 0x6b1   :  { %v3582_v48 = vpop.f32.mrb[16].mxu1 }
 0x6b2   :  { %v2797_v49 = vpop.f32.mrb[17].mxu1 }
 0x6b3   :  { %v574_v50 = vpop.f32.mrb[18].mxu1 }
 0x6b4   :  { %v2798_v51 = vpop.f32.mrb[19].mxu1 }
 0x6b5   :  { %v3584_v52 = vpop.f32.mrb[12].mxu0 }
 0x6b6   :  { %v3024_v53 = vpack.i.bf16 %v3584_v52, %v3582_v48  ;;  %v2803_v54 = vpop.f32.mrb[13].mxu0 }
 0x6b7   :  { %v622_v55 = vpop.f32.mrb[14].mxu0 }
 0x6b8   :  { %v2804_v56 = vpop.f32.mrb[15].mxu0 }
 0x6b9   :  { %v669_v57 = vpop.f32.mrb[20].mxu1 }
 0x6ba   :  { %v2809_v58 = vpop.f32.mrb[21].mxu1  ;;  %v725_v60 = vsel %vm189_vm2, %v669_v57, -inf }
 0x6bb   :  { %726 = vmax.xlane.f32.xlu0 %v725_v60  ;;  %v672_v61 = vpop.f32.mrb[22].mxu1 }
 0x6bc   :  { %v2810_v62 = vpop.f32.mrb[23].mxu1 }
 0x6bd   :  { %v719_v1 = vpop.f32.mrb[16].mxu0 }
 0x6be   :  { %v2815_v2 = vpop.f32.mrb[17].mxu0  ;;  %v728_v4 = vsel %vm189_vm2, %v719_v1, -inf }
 0x6bf   :  { %729 = vmax.xlane.f32.xlu1 %v728_v4  ;;  %v722_v8 = vpop.f32.mrb[18].mxu0 }
 0x6c0   :  { %v2816_v9 = vpop.f32.mrb[19].mxu0 }
 0x6d0   :  { %749 = vrot.lane.b32.xlu1 %v3488_v13, %s3305_s23 }
 0x6d4   :  { %847 = vrot.lane.b32.xlu1 %v3488_v13, %s3306_s24 }
 0x6d8   :  { %897 = vrot.lane.b32.xlu1 %v3492_v16, %s3306_s24 }
 0x6dc   :  { %895 = vrot.lane.b32.xlu1 %v3492_v16, %s3307_s27 }
 0x748   :  { %v727_v10 = vpop.xlane.xlu0 %726 }
 0x749   :  { %v731_v11 = vsub.f32 %v669_v57, %v727_v10 }
 0x74b   :  { %v733_v12 = vmul.f32 1.442695, %v731_v11 }
 0x74c   :  { %v730_v14 = vpop.xlane.xlu1 %729 }
 0x74d   :  { %3089 = vpow2.f32 %v733_v12  ;;  %v732_v15 = vsub.f32 %v719_v1, %v730_v14 }
 0x74f   :  { %v735_v17 = vmul.f32 1.442695, %v732_v15 }
 0x750   :  { %v750_v18 = vpop.permute.xlu1 %749 }
 0x751   :  { %3091 = vpow2.f32 %v735_v17  ;;  %v755_v19 = vsel %vm313_vm3, %v750_v18, 0 }
 0x752   :  { %2818 = vmatpush3.bf16.msra.mxu1 %v755_v19 }
 0x753   :  { %2829 = vmatprep.subr.bf16.mxu1 %v3297_v0 }
 0x754   :  { %v848_v29 = vpop.permute.xlu1 %847 }
 0x755   :  { %v853_v33 = vsel %vm189_vm2, %v848_v29, 0 }
 0x757   :  { %v3090_v20 = vpop.eup %3089 }
 0x758   :  { %v737_v21 = vsel %vm189_vm2, %v3090_v20, 0.0  ;;  %v898_v35 = vpop.permute.xlu1 %897 }
 0x759   :  { %738 = vadd.xlane.f32.xlu0 %v737_v21  ;;  %v903_v37 = vsel %vm189_vm2, %v898_v35, 0 }
 0x75b   :  { %v3092_v22 = vpop.eup %3091 }
 0x75c   :  { %v740_v23 = vsel %vm189_vm2, %v3092_v22, 0.0  ;;  %v896_v39 = vpop.permute.xlu1 %895 }
 0x75d   :  { %741 = vadd.xlane.f32.xlu0 %v740_v23 }
 0x773   :  { %797 = vrot.lane.b32.xlu0 %v3492_v16, %s3305_s23 }
 0x777   :  { %845 = vrot.lane.b32.xlu0 %v3488_v13, %s3307_s27 }
 0x7e6   :  { %v739_v24 = vpop.xlane.xlu0 %738 }
 0x7e7   :  { %3093 = vrcp.f32 %v739_v24  ;;  %v3057_v24 = vld [vmem:[%s3960_s3] sm:$0xff]  }
 0x7ea   :  { %v742_v25 = vpop.xlane.xlu0 %741 }
 0x7eb   :  { %3095 = vrcp.f32 %v742_v25  ;;  %v3058_v25 = vld [vmem:[%s3960_s3 + $0x8] sm:$0xff]  }
 0x7ee   :  { %v798_v26 = vpop.permute.xlu0 %797 }
 0x7ef   :  { %v803_v27 = vsel %vm313_vm3, %v798_v26, 0 }
 0x7f0   :  { %2824 = vmatpush3.bf16.msra.mxu0 %v803_v27 }
 0x7f1   :  { %v3094_v28 = vpop.eup %3093  ;;  %2835 = vmatprep.subr.bf16.mxu0 %v3297_v0 }
 0x7f2   :  { %v745_v30 = vmul.f32 %v3094_v28, %v3090_v20  ;;  %v846_v38 = vpop.permute.xlu0 %845 }
 0x7f4   :  { %v747_v31 = vpack.c.bf16 %v745_v30, %v745_v30 }
 0x7f5   :  { %v3096_v32 = vpop.eup %3095 }
 0x7f6   :  { %v746_v34 = vmul.f32 %v3096_v32, %v3092_v22  ;;  %2820 = vmatmul.mubr.msk.bf16.vlgmr.msra.gmra.mrb[24].mxu1 %vm189_vm2, %v747_v31 }
 0x7f7   :  { %2830 = vmatpush3.bf16.xpose.msra.mxu1 %v853_v33  ;;  %2831 = vmatprep.mubr.msk.bf16.mxu1 %vm3298_vm0, %v3297_v0 }
 0x7f8   :  { %v748_v36 = vpack.c.bf16 %v746_v34, %v746_v34  ;;  %2841 = vmatprep.subr.bf16.mxu1 %v3297_v0 }
 0x7fa   :  { %2826 = vmatmul.mubr.msk.bf16.vlgmr.msra.gmra.mrb[20].mxu0 %vm189_vm2, %v748_v36 }
 0x7fb   :  { %2836 = vmatpush3.bf16.xpose.msra.mxu0 %v903_v37  ;;  %2837 = vmatprep.mubr.msk.bf16.mxu0 %vm3298_vm0, %v3297_v0 }
 0x7fc   :  { %2847 = vmatprep.subr.bf16.mxu0 %v3297_v0 }
 0x7fe   :  { %2832 = vmatmul.mubr.msk.bf16.vlgmr.msra.gmra.mrb[28].mxu1 %vm189_vm2, %v846_v38 }
 0x7ff   :  { %2843 = vmatprep.mubr.msk.bf16.mxu1 %vm3298_vm0, %v3297_v0 }
 0x802   :  { %2838 = vmatmul.mubr.msk.bf16.vlgmr.msra.gmra.mrb[24].mxu0 %vm189_vm2, %v896_v39 }
 0x803   :  { %2849 = vmatprep.mubr.msk.bf16.mxu0 %vm3298_vm0, %v3297_v0 }
 0x8c9   :  { %v791_v40 = vpop.f32.mrb[24].mxu1 }
 0x8ca   :  { %v2821_v41 = vpop.f32.mrb[25].mxu1 }
 0x8cb   :  { %v794_v42 = vpop.f32.mrb[26].mxu1 }
 0x8cc   :  { %v2822_v43 = vpop.f32.mrb[27].mxu1 }
 0x8cd   :  { %v839_v44 = vpop.f32.mrb[20].mxu0 }
 0x8ce   :  { %v3029_v45 = vpack.i.bf16 %v839_v44, %v791_v40  ;;  %v2827_v46 = vpop.f32.mrb[21].mxu0 }
 0x8cf   :  { %v842_v47 = vpop.f32.mrb[22].mxu0 }
 0x8d0   :  { %v2828_v49 = vpop.f32.mrb[23].mxu0 }
 0x8d1   :  { %v889_v50 = vpop.f32.mrb[28].mxu1 }
 0x8d2   :  { %v2833_v51 = vpop.f32.mrb[29].mxu1  ;;  %v945_v54 = vsel %vm189_vm2, %v889_v50, -inf }
 0x8d3   :  { %946 = vmax.xlane.f32.xlu0 %v945_v54  ;;  %v892_v55 = vpop.f32.mrb[30].mxu1  ;;  %v1162_v54 = vunpack.c.l.bf16 %v3469_v3 }
 0x8d4   :  { %v2834_v56 = vpop.f32.mrb[31].mxu1 }
 0x8d5   :  { %v939_v57 = vpop.f32.mrb[24].mxu0 }
 0x8d6   :  { %v2839_v58 = vpop.f32.mrb[25].mxu0  ;;  %v948_v60 = vsel %vm189_vm2, %v939_v57, -inf }
 0x8d7   :  { %949 = vmax.xlane.f32.xlu1 %v948_v60  ;;  %v942_v61 = vpop.f32.mrb[26].mxu0  ;;  %v1163_v58 = vunpack.c.h.bf16 %v3469_v3  ;;  %v3059_v3 = vld [vmem:[#allocation7] sm:$0xff]  }
 0x8d8   :  { %v2840_v62 = vpop.f32.mrb[27].mxu0 }
 0x8e8   :  { %969 = vrot.lane.b32.xlu1 %v3488_v13, %s3308_s28 }
 0x8ec   :  { %3025 = vrot.lane.b32.xlu1 %v3024_v53, %s3309_s29 }
 0x8f0   :  { %3030 = vrot.lane.b32.xlu1 %v3029_v45, %s3310_s30 }
 0x960   :  { %v947_v1 = vpop.xlane.xlu0 %946 }
 0x961   :  { %v951_v2 = vsub.f32 %v889_v50, %v947_v1 }
 0x963   :  { %v953_v4 = vmul.f32 1.442695, %v951_v2 }
 0x964   :  { %v950_v8 = vpop.xlane.xlu1 %949 }
 0x965   :  { %3097 = vpow2.f32 %v953_v4  ;;  %v952_v9 = vsub.f32 %v939_v57, %v950_v8 }
 0x967   :  { %v955_v10 = vmul.f32 1.442695, %v952_v9 }
 0x968   :  { %v970_v11 = vpop.permute.xlu1 %969 }
 0x969   :  { %3099 = vpow2.f32 %v955_v10  ;;  %v975_v13 = vsel %vm313_vm3, %v970_v11, 0 }
 0x96a   :  { %2842 = vmatpush3.bf16.msra.mxu1 %v975_v13 }
 0x96b   :  { %2853 = vmatprep.subr.bf16.mxu1 %v3297_v0 }
 0x96c   :  { %v3026_v35 = vpop.permute.xlu1 %3025 }
 0x96d   :  { %v3028_v37 = vunpack.i.h.bf16 %v3026_v35  ;;  %v3027_v38 = vunpack.i.l.bf16 %v3026_v35 }
 0x96f   :  { %v3098_v12 = vpop.eup %3097  ;;  %v1090_v42 = vsel %vm189_vm2, %v3546_v63, %v3028_v37  ;;  %v1089_v43 = vsel %vm189_vm2, %v3544_v59, %v3027_v38  ;;  %v1104_v63 = vsub.s32 1, %v3477_v5 }
 0x970   :  { %v957_v48 = vsel %vm189_vm2, %v3098_v12, 0.0  ;;  %v3031_v36 = vpop.permute.xlu1 %3030 }
 0x971   :  { %958 = vadd.xlane.f32.xlu0 %v957_v48  ;;  %v3033_v39 = vunpack.i.h.bf16 %v3031_v36  ;;  %v3032_v40 = vunpack.i.l.bf16 %v3031_v36  ;;  %v1105_v59 = vrot.slane %v3483_v7, %v1104_v63  ;;  %v3061_v48 = vld [vmem:[#allocation5] sm:$0xff]  }
 0x973   :  { %v3100_v52 = vpop.eup %3099  ;;  %v1093_v46 = vsel %vm1091_vm4, %v1090_v42, %v3033_v39  ;;  %v1092_v47 = vsel %vm1091_vm4, %v1089_v43, %v3032_v40  ;;  %v1280_v43 = vsub.s32 3, %v3477_v5 }
 0x974   :  { %v960_v53 = vsel %vm189_vm2, %v3100_v52, 0.0 }
 0x975   :  { %961 = vadd.xlane.f32.xlu0 %v960_v53  ;;  %v3063_v53 = vld [vmem:[%s3961_s4 + $0x8] sm:$0xff]  }
 0x98b   :  { %1017 = vrot.lane.b32.xlu0 %v3492_v16, %s3308_s28 }
 0x9fe   :  { %v959_v14 = vpop.xlane.xlu0 %958 }
 0x9ff   :  { %3101 = vrcp.f32 %v959_v14 }
 0xa02   :  { %v962_v15 = vpop.xlane.xlu0 %961 }
 0xa03   :  { %3103 = vrcp.f32 %v962_v15 }
 0xa06   :  { %v1018_v17 = vpop.permute.xlu0 %1017 }
 0xa07   :  { %v1023_v18 = vsel %vm313_vm3, %v1018_v17, 0 }
 0xa08   :  { %2848 = vmatpush3.bf16.msra.mxu0 %v1023_v18 }
 0xa09   :  { %v3102_v19 = vpop.eup %3101  ;;  %2861 = vmatprep.subr.bf16.mxu0 %v3297_v0 }
 0xa0a   :  { %v965_v20 = vmul.f32 %v3102_v19, %v3098_v12  ;;  %v3060_v12 = vld [vmem:[#allocation7 + $0x8] sm:$0xff]  }
 0xa0c   :  { %v967_v21 = vpack.c.bf16 %v965_v20, %v965_v20 }
 0xa0d   :  { %v3104_v22 = vpop.eup %3103 }
 0xa0e   :  { %v966_v23 = vmul.f32 %v3104_v22, %v3100_v52  ;;  %2844 = vmatmul.mubr.msk.bf16.vlgmr.msra.gmra.mrb[32].mxu1 %vm189_vm2, %v967_v21  ;;  %v3062_v52 = vld [vmem:[%s3961_s4] sm:$0xff]  }
 0xa0f   :  { %2857 = vmatprep.mubr.msk.bf16.mxu1 %vm3298_vm0, %v3297_v0  ;;  %2854 = vmatpush3.bf16.msra.mxu1 %v3057_v24 }
 0xa10   :  { %v968_v16 = vpack.c.bf16 %v966_v23, %v966_v23  ;;  %2855 = vmatprep.subr.bf16.mxu1 %v3297_v0 }
 0xa12   :  { %2850 = vmatmul.mubr.msk.bf16.vlgmr.msra.gmra.mrb[28].mxu0 %vm189_vm2, %v968_v16 }
 0xa13   :  { %2865 = vmatprep.mubr.msk.bf16.mxu0 %vm3298_vm0, %v3297_v0  ;;  %2856 = vmatpush3.bf16.msra.mxu1 %v3058_v25 }
 0xa14   :  { %2869 = vmatprep.subr.bf16.mxu1 %v3297_v0  ;;  %2862 = vmatpush3.bf16.msra.mxu0 %v3062_v52 }
 0xa15   :  { %2863 = vmatprep.subr.bf16.mxu0 %v3297_v0 }
 0xa18   :  { %2864 = vmatpush3.bf16.msra.mxu0 %v3063_v53 }
 0xa19   :  { %2877 = vmatprep.subr.bf16.mxu0 %v3297_v0 }
 0xae1   :  { %v1011_v26 = vpop.f32.mrb[32].mxu1 }
 0xae2   :  { %v2845_v27 = vpop.f32.mrb[33].mxu1 }
 0xae3   :  { %v1014_v28 = vpop.f32.mrb[34].mxu1 }
 0xae4   :  { %v2846_v29 = vpop.f32.mrb[35].mxu1  ;;  %v1197_v28 = vsub.s32 7, %v3477_v5 }
 0xae5   :  { %v1059_v30 = vpop.f32.mrb[28].mxu0 }
 0xae6   :  { %v3034_v31 = vpack.i.bf16 %v1059_v30, %v1011_v26  ;;  %v2851_v32 = vpop.f32.mrb[29].mxu0  ;;  %v1198_v29 = vrot.slane %v3483_v7, %v1197_v28 }
 0xae7   :  { %v1062_v33 = vpop.f32.mrb[30].mxu0 }
 0xae8   :  { %v2852_v34 = vpop.f32.mrb[31].mxu0  ;;  %3035 = vrot.lane.b32.xlu0 %v3034_v31, %s3311_s5  ;;  %v3691_v31 = vld [vmem:[%s3966_s9 + $0x8] sm:$0xff] }
 0xae9   :  { %v1206_v35 = vrot.slane %v3691_v31, %v117_v6  ;;  %v1281_v6 = vrot.slane %v3483_v7, %v1280_v43 }
 0xb5a   :  { %v3036_v41 = vpop.permute.xlu0 %3035 }
 0xb5b   :  { %v3038_v44 = vunpack.i.h.bf16 %v3036_v41  ;;  %v3037_v45 = vunpack.i.l.bf16 %v3036_v41 }
 0xb5d   :  { %v1096_v49 = vsel %vm1094_vm5, %v1093_v46, %v3038_v44  ;;  %v1095_v50 = vsel %vm1094_vm5, %v1092_v47, %v3037_v45 }
 0xb5e   :  { %v1097_v51 = vpack.c.bf16 %v1096_v49, %v1095_v50 }
 0xb60   :  { %2858 = vmatmul.mubr.msk.bf16.vlgmr.msra.gmra.mrb[36].mxu1 %vm136_vm1, %v1097_v51 }
 0xb61   :  { %2873 = vmatprep.mubr.msk.bf16.mxu1 %vm3298_vm0, %v3297_v0  ;;  %2870 = vmatpush3.bf16.msra.mxu1 %v3059_v3 }
 0xb62   :  { %2871 = vmatprep.subr.bf16.mxu1 %v3297_v0 }
 0xb65   :  { %2872 = vmatpush3.bf16.msra.mxu1 %v3060_v12 }
 0xb66   :  { %2883 = vmatprep.subr.bf16.mxu1 %v3297_v0 }
 0xb68   :  { %2874 = vmatmul.mubr.msk.bf16.vlgmr.msra.gmra.mrb[40].mxu1 %vm136_vm1, %v3061_v48 }
 0xb69   :  { %2885 = vmatprep.mubr.msk.bf16.mxu1 %vm3298_vm0, %v3297_v0 }
 0xc33   :  { %v1155_v55 = vpop.f32.mrb[36].mxu1 }
 0xc34   :  { %v1156_v56 = vadd.f32 %v1155_v55, %v1105_v59  ;;  %v2859_v57 = vpop.f32.mrb[37].mxu1 }
 0xc35   :  { %v1158_v60 = vpop.f32.mrb[38].mxu1 }
 0xc36   :  { %v1164_v61 = vadd.f32 %v1162_v54, %v1156_v56  ;;  %v1159_v62 = vadd.f32 %v1158_v60, %v1105_v59  ;;  %v2860_v1 = vpop.f32.mrb[39].mxu1  ;;  %v1216_v56 = vsub.s32 2, %v3477_v5 }
 0xc38   :  { %v1165_v2 = vadd.f32 %v1163_v58, %v1159_v62  ;;  %v1166_v4 = vsel %vm136_vm1, %v1164_v61, 0.0  ;;  %v1175_v10 = vmul.f32 %v1164_v61, %v1164_v61  ;;  %v1217_v57 = vrot.slane %v3483_v7, %v1216_v56 }
 0xc39   :  { %1167 = vadd.xlane.f32.xlu1 %v1166_v4 }
 0xc3a   :  { %v1169_v8 = vsel %vm136_vm1, %v1165_v2, 0.0  ;;  %v1176_v9 = vmul.f32 %v1165_v2, %v1165_v2  ;;  %v1177_v13 = vsel %vm136_vm1, %v1175_v10, 0.0 }
 0xc3b   :  { %1170 = vadd.xlane.f32.xlu0 %v1169_v8  ;;  %v1336_v44 = vpop.f32.mrb[40].mxu1 }
 0xc3c   :  { %v1180_v11 = vsel %vm136_vm1, %v1176_v9, 0.0  ;;  %v1337_v45 = vadd.f32 %v1336_v44, %v1281_v6  ;;  %v2875_v46 = vpop.f32.mrb[41].mxu1 }
 0xc3d   :  { %1181 = vadd.xlane.f32.xlu1 %v1180_v11  ;;  %v1339_v47 = vpop.f32.mrb[42].mxu1 }
 0xc3e   :  { %v3709_v49 = vpack.c.bf16 %v1337_v45, %v1337_v45  ;;  %v1340_v50 = vadd.f32 %v1339_v47, %v1281_v6  ;;  %v2876_v51 = vpop.f32.mrb[43].mxu1 }
 0xc3f   :  { %1178 = vadd.xlane.f32.xlu0 %v1177_v13 }
 0xc40   :  { %v3711_v59 = vpack.c.bf16 %v1340_v50, %v1340_v50  ;;  %v1359_v54 = vsel %vm189_vm2, %v3709_v49, 0 }
 0xc42   :  { %v1405_v55 = vsel %vm189_vm2, %v3711_v59, 0 }
 0xc43   :  { %2884 = vmatpush3.bf16.xpose.msra.mxu1 %v1405_v55 }
 0xc44   :  { %2895 = vmatprep.subr.bf16.mxu1 %v3297_v0 }
 0xcc6   :  { %v1168_v14 = vpop.xlane.xlu1 %1167 }
 0xcc7   :  { %v1173_v17 = vmul.f32 0.03125, %v1168_v14 }
 0xcc8   :  { %v1171_v15 = vpop.xlane.xlu0 %1170 }
 0xcc9   :  { %v1174_v18 = vmul.f32 0.03125, %v1171_v15  ;;  %v1185_v23 = vmul.f32 %v1173_v17, %v1173_v17  ;;  %v1189_v36 = vsub.f32 %v1164_v61, %v1173_v17 }
 0xcca   :  { %v1182_v19 = vpop.xlane.xlu1 %1181 }
 0xccb   :  { %v1186_v20 = vmul.f32 %v1174_v18, %v1174_v18  ;;  %v1184_v21 = vmul.f32 0.03125, %v1182_v19  ;;  %v1190_v32 = vsub.f32 %v1165_v2, %v1174_v18 }
 0xccc   :  { %v1179_v22 = vpop.xlane.xlu0 %1178 }
 0xccd   :  { %v1188_v16 = vsub.f32 %v1184_v21, %v1186_v20  ;;  %v1183_v24 = vmul.f32 0.03125, %v1179_v22 }
 0xccf   :  { %v1192_v25 = vadd.f32 1e-05, %v1188_v16  ;;  %v1187_v26 = vsub.f32 %v1183_v24, %v1185_v23 }
 0xcd1   :  { %3105 = vrsqrt.f32 %v1192_v25  ;;  %v1191_v27 = vadd.f32 1e-05, %v1187_v26 }
 0xcd3   :  { %3107 = vrsqrt.f32 %v1191_v27 }
 0xcdb   :  { %v3106_v30 = vpop.eup %3105 }
 0xcdc   :  { %v1200_v33 = vmul.f32 %v3106_v30, %v1198_v29 }
 0xcdd   :  { %v3108_v34 = vpop.eup %3107 }
 0xcde   :  { %v1199_v37 = vmul.f32 %v3108_v34, %v1198_v29  ;;  %v1202_v38 = vmul.f32 %v1200_v33, %v1190_v32 }
 0xce0   :  { %v1201_v39 = vmul.f32 %v1199_v37, %v1189_v36  ;;  %v3698_v41 = vadd.f32 %v1206_v35, %v1202_v38 }
 0xce2   :  { %v3696_v40 = vadd.f32 %v1206_v35, %v1201_v39 }
 0xce4   :  { %v1209_v42 = vpack.c.bf16 %v3698_v41, %v3696_v40 }
 0xce6   :  { %2866 = vmatmul.mubr.msk.bf16.vlgmr.msra.gmra.mrb[32].mxu0 %vm136_vm1, %v1209_v42 }
 0xce7   :  { %2879 = vmatprep.mubr.msk.bf16.mxu0 %vm3298_vm0, %v3297_v0  ;;  %2878 = vmatpush3.bf16.xpose.msra.mxu0 %v1359_v54 }
 0xce8   :  { %2889 = vmatprep.subr.bf16.mxu0 %v3297_v0 }
 0xdb9   :  { %v1267_v58 = vpop.f32.mrb[32].mxu0 }
 0xdba   :  { %v1268_v60 = vadd.f32 %v1267_v58, %v1217_v57  ;;  %v2867_v61 = vpop.f32.mrb[33].mxu0 }
 0xdbb   :  { %v1270_v62 = vpop.f32.mrb[34].mxu0 }
 0xdbc   :  { %v3723_v1 = vpack.c.bf16 %v1268_v60, %v1268_v60  ;;  %v1271_v2 = vadd.f32 %v1270_v62, %v1217_v57  ;;  %v2868_v4 = vpop.f32.mrb[35].mxu0 }
 0xdbe   :  { %v3725_v8 = vpack.c.bf16 %v1271_v2, %v1271_v2  ;;  %2880 = vmatmul.mubr.msk.bf16.vlgmr.msra.gmra.mrb[36].mxu0 %vm189_vm2, %v3723_v1 }
 0xdbf   :  { %2891 = vmatprep.mubr.msk.bf16.mxu0 %vm3298_vm0, %v3297_v0 }
 0xdc0   :  { %2886 = vmatmul.mubr.msk.bf16.vlgmr.msra.gmra.mrb[44].mxu1 %vm189_vm2, %v3725_v8 }
 0xdc1   :  { %2897 = vmatprep.mubr.msk.bf16.mxu1 %vm3298_vm0, %v3297_v0 }
 0xe91   :  { %v1395_v7 = vpop.f32.mrb[36].mxu0 }
 0xe92   :  { %v2881_v9 = vpop.f32.mrb[37].mxu0  ;;  %v1447_v10 = vsel %vm189_vm2, %v1395_v7, -inf }
 0xe93   :  { %1448 = vmax.xlane.f32.xlu0 %v1447_v10  ;;  %v1398_v11 = vpop.f32.mrb[38].mxu0  ;;  %v1441_v13 = vpop.f32.mrb[44].mxu1 }
 0xe94   :  { %v2882_v3 = vpop.f32.mrb[39].mxu0  ;;  %v2887_v12 = vpop.f32.mrb[45].mxu1  ;;  %v1450_v48 = vsel %vm189_vm2, %v1441_v13, -inf }
 0xe95   :  { %1451 = vmax.xlane.f32.xlu1 %v1450_v48  ;;  %v1444_v52 = vpop.f32.mrb[46].mxu1 }
 0xe96   :  { %v2888_v53 = vpop.f32.mrb[47].mxu1 }
 0xea6   :  { %1519 = vrot.lane.b32.xlu1 %v3711_v59, %s3299_s1 }
 0xea9   :  { %1471 = vrot.lane.b32.xlu0 %v3709_v49, %s3299_s1 }
 0xf20   :  { %v1449_v14 = vpop.xlane.xlu0 %1448 }
 0xf21   :  { %v1453_v15 = vsub.f32 %v1395_v7, %v1449_v14 }
 0xf22   :  { %v1452_v17 = vpop.xlane.xlu1 %1451 }
 0xf23   :  { %v1455_v18 = vmul.f32 1.442695, %v1453_v15  ;;  %v1454_v19 = vsub.f32 %v1441_v13, %v1452_v17 }
 0xf24   :  { %v1472_v20 = vpop.permute.xlu0 %1471 }
 0xf25   :  { %3109 = vpow2.f32 %v1455_v18  ;;  %v1457_v21 = vmul.f32 1.442695, %v1454_v19  ;;  %v1477_v22 = vsel %vm313_vm3, %v1472_v20, 0 }
 0xf26   :  { %2890 = vmatpush3.bf16.msra.mxu0 %v1477_v22  ;;  %v1520_v23 = vpop.permute.xlu1 %1519 }
 0xf27   :  { %3111 = vpow2.f32 %v1457_v21  ;;  %v1525_v16 = vsel %vm313_vm3, %v1520_v23, 0  ;;  %2901 = vmatprep.subr.bf16.mxu0 %v3297_v0 }
 0xf28   :  { %2896 = vmatpush3.bf16.msra.mxu1 %v1525_v16 }
 0xf29   :  { %2907 = vmatprep.subr.bf16.mxu1 %v3297_v0 }
 0xf2f   :  { %v3110_v24 = vpop.eup %3109 }
 0xf30   :  { %v1459_v25 = vsel %vm189_vm2, %v3110_v24, 0.0 }
 0xf31   :  { %v3112_v26 = vpop.eup %3111  ;;  %1460 = vadd.xlane.f32.xlu0 %v1459_v25 }
 0xf32   :  { %v1462_v27 = vsel %vm189_vm2, %v3112_v26, 0.0 }
 0xf33   :  { %1463 = vadd.xlane.f32.xlu1 %v1462_v27 }
 0xf44   :  { %1569 = vrot.lane.b32.xlu1 %v3709_v49, %s3301_s19 }
 0xf47   :  { %1619 = vrot.lane.b32.xlu0 %v3711_v59, %s3301_s19 }
 0xf48   :  { %1567 = vrot.lane.b32.xlu1 %v3723_v1, %s3301_s19 }
 0xf4b   :  { %1617 = vrot.lane.b32.xlu0 %v3725_v8, %s3301_s19 }
 0xfbe   :  { %v1461_v28 = vpop.xlane.xlu0 %1460 }
 0xfbf   :  { %3113 = vrcp.f32 %v1461_v28 }
 0xfc0   :  { %v1464_v29 = vpop.xlane.xlu1 %1463 }
 0xfc1   :  { %3115 = vrcp.f32 %v1464_v29 }
 0xfc2   :  { %v1620_v37 = vpop.permute.xlu0 %1619 }
 0xfc3   :  { %v1625_v42 = vsel %vm189_vm2, %v1620_v37, 0 }
 0xfc4   :  { %v1570_v34 = vpop.permute.xlu1 %1569 }
 0xfc5   :  { %v1575_v38 = vsel %vm189_vm2, %v1570_v34, 0 }
 0xfc6   :  { %v1618_v44 = vpop.permute.xlu0 %1617 }
 0xfc8   :  { %v1568_v6 = vpop.permute.xlu1 %1567 }
 0xfc9   :  { %v3114_v30 = vpop.eup %3113 }
 0xfca   :  { %v1467_v32 = vmul.f32 %v3114_v30, %v3110_v24 }
 0xfcb   :  { %v3116_v33 = vpop.eup %3115 }
 0xfcc   :  { %v1468_v35 = vmul.f32 %v3116_v33, %v3112_v26  ;;  %v1469_v36 = vpack.c.bf16 %v1467_v32, %v1467_v32 }
 0xfce   :  { %2892 = vmatmul.mubr.msk.bf16.vlgmr.msra.gmra.mrb[40].mxu0 %vm189_vm2, %v1469_v36  ;;  %v1470_v39 = vpack.c.bf16 %v1468_v35, %v1468_v35 }
 0xfcf   :  { %2902 = vmatpush3.bf16.xpose.msra.mxu0 %v1575_v38  ;;  %2903 = vmatprep.mubr.msk.bf16.mxu0 %vm3298_vm0, %v3297_v0 }
 0xfd0   :  { %2898 = vmatmul.mubr.msk.bf16.vlgmr.msra.gmra.mrb[48].mxu1 %vm189_vm2, %v1470_v39  ;;  %2913 = vmatprep.subr.bf16.mxu0 %v3297_v0 }
 0xfd1   :  { %2908 = vmatpush3.bf16.xpose.msra.mxu1 %v1625_v42  ;;  %2909 = vmatprep.mubr.msk.bf16.mxu1 %vm3298_vm0, %v3297_v0 }
 0xfd2   :  { %2919 = vmatprep.subr.bf16.mxu1 %v3297_v0 }
 0xfd6   :  { %2904 = vmatmul.mubr.msk.bf16.vlgmr.msra.gmra.mrb[44].mxu0 %vm189_vm2, %v1568_v6 }
 0xfd7   :  { %2915 = vmatprep.mubr.msk.bf16.mxu0 %vm3298_vm0, %v3297_v0 }
 0xfd8   :  { %2910 = vmatmul.mubr.msk.bf16.vlgmr.msra.gmra.mrb[52].mxu1 %vm189_vm2, %v1618_v44 }
 0xfd9   :  { %2921 = vmatprep.mubr.msk.bf16.mxu1 %vm3298_vm0, %v3297_v0 }
0x10a1   :  { %v3771_v45 = vpop.f32.mrb[40].mxu0 }
0x10a2   :  { %v2893_v46 = vpop.f32.mrb[41].mxu0 }
0x10a3   :  { %v1516_v47 = vpop.f32.mrb[42].mxu0  ;;  %v3773_v50 = vpop.f32.mrb[48].mxu1 }
0x10a4   :  { %v2894_v51 = vpop.f32.mrb[43].mxu0  ;;  %v2899_v54 = vpop.f32.mrb[49].mxu1 }
0x10a5   :  { %v1564_v55 = vpop.f32.mrb[50].mxu1 }
0x10a6   :  { %v2900_v57 = vpop.f32.mrb[51].mxu1 }
0x10a9   :  { %v1611_v58 = vpop.f32.mrb[44].mxu0 }
0x10aa   :  { %v2905_v60 = vpop.f32.mrb[45].mxu0  ;;  %v1667_v61 = vsel %vm189_vm2, %v1611_v58, -inf }
0x10ab   :  { %1668 = vmax.xlane.f32.xlu1 %v1667_v61  ;;  %v1614_v62 = vpop.f32.mrb[46].mxu0  ;;  %v1661_v2 = vpop.f32.mrb[52].mxu1 }
0x10ac   :  { %v2906_v4 = vpop.f32.mrb[47].mxu0  ;;  %v2911_v7 = vpop.f32.mrb[53].mxu1  ;;  %v1670_v9 = vsel %vm189_vm2, %v1661_v2, -inf }
0x10ad   :  { %1671 = vmax.xlane.f32.xlu0 %v1670_v9  ;;  %v1664_v10 = vpop.f32.mrb[54].mxu1 }
0x10ae   :  { %v2912_v11 = vpop.f32.mrb[55].mxu1 }
0x10bc   :  { %1739 = vrot.lane.b32.xlu1 %v3711_v59, %s3300_s14 }
0x10c3   :  { %1691 = vrot.lane.b32.xlu0 %v3709_v49, %s3300_s14 }
0x1138   :  { %v1669_v13 = vpop.xlane.xlu1 %1668 }
0x1139   :  { %v1673_v3 = vsub.f32 %v1611_v58, %v1669_v13 }
0x113a   :  { %v1672_v12 = vpop.xlane.xlu0 %1671 }
0x113b   :  { %v1675_v48 = vmul.f32 1.442695, %v1673_v3  ;;  %v1674_v52 = vsub.f32 %v1661_v2, %v1672_v12 }
0x113c   :  { %v1740_v53 = vpop.permute.xlu1 %1739 }
0x113d   :  { %3117 = vpow2.f32 %v1675_v48  ;;  %v1677_v14 = vmul.f32 1.442695, %v1674_v52  ;;  %v1745_v15 = vsel %vm313_vm3, %v1740_v53, 0 }
0x113e   :  { %2920 = vmatpush3.bf16.msra.mxu1 %v1745_v15  ;;  %v1692_v17 = vpop.permute.xlu0 %1691 }
0x113f   :  { %3119 = vpow2.f32 %v1677_v14  ;;  %v1697_v18 = vsel %vm313_vm3, %v1692_v17, 0  ;;  %2931 = vmatprep.subr.bf16.mxu1 %v3297_v0 }
0x1140   :  { %2914 = vmatpush3.bf16.msra.mxu0 %v1697_v18 }
0x1141   :  { %2925 = vmatprep.subr.bf16.mxu0 %v3297_v0 }
0x1147   :  { %v3118_v19 = vpop.eup %3117 }
0x1148   :  { %v1679_v20 = vsel %vm189_vm2, %v3118_v19, 0.0 }
0x1149   :  { %v3120_v21 = vpop.eup %3119  ;;  %1680 = vadd.xlane.f32.xlu0 %v1679_v20 }
0x114a   :  { %v1682_v22 = vsel %vm189_vm2, %v3120_v21, 0.0 }
0x114b   :  { %1683 = vadd.xlane.f32.xlu1 %v1682_v22 }
0x115c   :  { %1789 = vrot.lane.b32.xlu1 %v3709_v49, %s3304_s20 }
0x115f   :  { %1839 = vrot.lane.b32.xlu0 %v3711_v59, %s3304_s20 }
0x1160   :  { %1787 = vrot.lane.b32.xlu1 %v3723_v1, %s3304_s20 }
0x1163   :  { %1837 = vrot.lane.b32.xlu0 %v3725_v8, %s3304_s20 }
0x11d6   :  { %v1681_v23 = vpop.xlane.xlu0 %1680 }
0x11d7   :  { %3121 = vrcp.f32 %v1681_v23 }
0x11d8   :  { %v1684_v16 = vpop.xlane.xlu1 %1683 }
0x11d9   :  { %3123 = vrcp.f32 %v1684_v16 }
0x11da   :  { %v1840_v30 = vpop.permute.xlu0 %1839 }
0x11db   :  { %v1845_v34 = vsel %vm189_vm2, %v1840_v30, 0 }
0x11dc   :  { %v1790_v27 = vpop.permute.xlu1 %1789 }
0x11dd   :  { %v1795_v32 = vsel %vm189_vm2, %v1790_v27, 0 }
0x11de   :  { %v1838_v36 = vpop.permute.xlu0 %1837 }
0x11e0   :  { %v1788_v35 = vpop.permute.xlu1 %1787 }
0x11e1   :  { %v3122_v24 = vpop.eup %3121 }
0x11e2   :  { %v1687_v25 = vmul.f32 %v3122_v24, %v3118_v19 }
0x11e3   :  { %v3124_v26 = vpop.eup %3123 }
0x11e4   :  { %v1688_v28 = vmul.f32 %v3124_v26, %v3120_v21  ;;  %v1689_v29 = vpack.c.bf16 %v1687_v25, %v1687_v25 }
0x11e6   :  { %2916 = vmatmul.mubr.msk.bf16.vlgmr.msra.gmra.mrb[48].mxu0 %vm189_vm2, %v1689_v29  ;;  %v1690_v33 = vpack.c.bf16 %v1688_v28, %v1688_v28 }
0x11e7   :  { %2926 = vmatpush3.bf16.xpose.msra.mxu0 %v1795_v32  ;;  %2927 = vmatprep.mubr.msk.bf16.mxu0 %vm3298_vm0, %v3297_v0 }
0x11e8   :  { %2922 = vmatmul.mubr.msk.bf16.vlgmr.msra.gmra.mrb[56].mxu1 %vm189_vm2, %v1690_v33  ;;  %2937 = vmatprep.subr.bf16.mxu0 %v3297_v0 }
0x11e9   :  { %2932 = vmatpush3.bf16.xpose.msra.mxu1 %v1845_v34  ;;  %2933 = vmatprep.mubr.msk.bf16.mxu1 %vm3298_vm0, %v3297_v0 }
0x11ea   :  { %2943 = vmatprep.subr.bf16.mxu1 %v3297_v0 }
0x11ee   :  { %2928 = vmatmul.mubr.msk.bf16.vlgmr.msra.gmra.mrb[52].mxu0 %vm189_vm2, %v1788_v35 }
0x11ef   :  { %2939 = vmatprep.mubr.msk.bf16.mxu0 %vm3298_vm0, %v3297_v0 }
0x11f0   :  { %2934 = vmatmul.mubr.msk.bf16.vlgmr.msra.gmra.mrb[60].mxu1 %vm189_vm2, %v1838_v36 }
0x11f1   :  { %2945 = vmatprep.mubr.msk.bf16.mxu1 %vm3298_vm0, %v3297_v0 }
0x12b9   :  { %v3811_v37 = vpop.f32.mrb[48].mxu0 }
0x12ba   :  { %v2917_v38 = vpop.f32.mrb[49].mxu0 }
0x12bb   :  { %v1736_v39 = vpop.f32.mrb[50].mxu0  ;;  %v3813_v42 = vpop.f32.mrb[56].mxu1 }
0x12bc   :  { %v3039_v6 = vpack.i.bf16 %v3813_v42, %v3811_v37  ;;  %v2918_v44 = vpop.f32.mrb[51].mxu0  ;;  %v2923_v46 = vpop.f32.mrb[57].mxu1 }
0x12bd   :  { %v1784_v47 = vpop.f32.mrb[58].mxu1 }
0x12be   :  { %v2924_v51 = vpop.f32.mrb[59].mxu1 }
0x12c1   :  { %v1831_v54 = vpop.f32.mrb[52].mxu0 }
0x12c2   :  { %v2929_v55 = vpop.f32.mrb[53].mxu0  ;;  %v1887_v57 = vsel %vm189_vm2, %v1831_v54, -inf }
0x12c3   :  { %1888 = vmax.xlane.f32.xlu1 %v1887_v57  ;;  %v1834_v58 = vpop.f32.mrb[54].mxu0  ;;  %v1881_v60 = vpop.f32.mrb[60].mxu1 }
0x12c4   :  { %v2930_v61 = vpop.f32.mrb[55].mxu0  ;;  %v2935_v62 = vpop.f32.mrb[61].mxu1  ;;  %v1890_v2 = vsel %vm189_vm2, %v1881_v60, -inf }
0x12c5   :  { %1891 = vmax.xlane.f32.xlu0 %v1890_v2  ;;  %v1884_v4 = vpop.f32.mrb[62].mxu1 }
0x12c6   :  { %v2936_v7 = vpop.f32.mrb[63].mxu1 }
0x12d4   :  { %1959 = vrot.lane.b32.xlu1 %v3711_v59, %s3303_s0 }
0x12db   :  { %1911 = vrot.lane.b32.xlu0 %v3709_v49, %s3303_s0 }
0x1350   :  { %v1889_v9 = vpop.xlane.xlu1 %1888 }
0x1351   :  { %v1893_v10 = vsub.f32 %v1831_v54, %v1889_v9 }
0x1352   :  { %v1892_v11 = vpop.xlane.xlu0 %1891 }
0x1353   :  { %v1895_v13 = vmul.f32 1.442695, %v1893_v10  ;;  %v1894_v3 = vsub.f32 %v1881_v60, %v1892_v11 }
0x1354   :  { %v1960_v12 = vpop.permute.xlu1 %1959 }
0x1355   :  { %3125 = vpow2.f32 %v1895_v13  ;;  %v1897_v48 = vmul.f32 1.442695, %v1894_v3  ;;  %v1965_v52 = vsel %vm313_vm3, %v1960_v12, 0 }
0x1356   :  { %2944 = vmatpush3.bf16.msra.mxu1 %v1965_v52  ;;  %v1912_v53 = vpop.permute.xlu0 %1911 }
0x1357   :  { %3127 = vpow2.f32 %v1897_v48  ;;  %v1917_v14 = vsel %vm313_vm3, %v1912_v53, 0  ;;  %2955 = vmatprep.subr.bf16.mxu1 %v3297_v0 }
0x1358   :  { %2938 = vmatpush3.bf16.msra.mxu0 %v1917_v14 }
0x1359   :  { %2949 = vmatprep.subr.bf16.mxu0 %v3297_v0 }
0x135f   :  { %v3126_v15 = vpop.eup %3125 }
0x1360   :  { %v1899_v17 = vsel %vm189_vm2, %v3126_v15, 0.0 }
0x1361   :  { %v3128_v18 = vpop.eup %3127  ;;  %1900 = vadd.xlane.f32.xlu0 %v1899_v17 }
0x1362   :  { %v1902_v19 = vsel %vm189_vm2, %v3128_v18, 0.0 }
0x1363   :  { %1903 = vadd.xlane.f32.xlu1 %v1902_v19 }
0x1374   :  { %2009 = vrot.lane.b32.xlu1 %v3709_v49, %s3307_s27 }
0x1377   :  { %2059 = vrot.lane.b32.xlu0 %v3711_v59, %s3307_s27 }
0x1378   :  { %2007 = vrot.lane.b32.xlu1 %v3723_v1, %s3307_s27 }
0x137b   :  { %2057 = vrot.lane.b32.xlu0 %v3725_v8, %s3307_s27 }
0x13ee   :  { %v1901_v20 = vpop.xlane.xlu0 %1900 }
0x13ef   :  { %3129 = vrcp.f32 %v1901_v20 }
0x13f0   :  { %v1904_v21 = vpop.xlane.xlu1 %1903 }
0x13f1   :  { %3131 = vrcp.f32 %v1904_v21  ;;  %v3064_v21 = vld [vmem:[#allocation8] sm:$0xff]  }
0x13f2   :  { %v2060_v27 = vpop.permute.xlu0 %2059 }
0x13f3   :  { %v2065_v1 = vsel %vm189_vm2, %v2060_v27, 0 }
0x13f4   :  { %v2010_v24 = vpop.permute.xlu1 %2009 }
0x13f5   :  { %v2015_v28 = vsel %vm189_vm2, %v2010_v24, 0 }
0x13f6   :  { %v2058_v30 = vpop.permute.xlu0 %2057 }
0x13f8   :  { %v2008_v8 = vpop.permute.xlu1 %2007 }
0x13f9   :  { %v3130_v22 = vpop.eup %3129 }
0x13fa   :  { %v1907_v23 = vmul.f32 %v3130_v22, %v3126_v15  ;;  %v3065_v22 = vld [vmem:[#allocation8 + $0x8] sm:$0xff]  }
0x13fb   :  { %v3132_v16 = vpop.eup %3131 }
0x13fc   :  { %v1908_v25 = vmul.f32 %v3132_v16, %v3128_v18  ;;  %v1909_v26 = vpack.c.bf16 %v1907_v23, %v1907_v23 }
0x13fe   :  { %2940 = vmatmul.mubr.msk.bf16.vlgmr.msra.gmra.mrb[56].mxu0 %vm189_vm2, %v1909_v26  ;;  %v1910_v29 = vpack.c.bf16 %v1908_v25, %v1908_v25 }
0x13ff   :  { %2950 = vmatpush3.bf16.xpose.msra.mxu0 %v2015_v28  ;;  %2951 = vmatprep.mubr.msk.bf16.mxu0 %vm3298_vm0, %v3297_v0 }
0x1400   :  { %2946 = vmatmul.mubr.msk.bf16.vlgmr.msra.gmra.mrb[64].mxu1 %vm189_vm2, %v1910_v29  ;;  %2961 = vmatprep.subr.bf16.mxu0 %v3297_v0 }
0x1401   :  { %2956 = vmatpush3.bf16.xpose.msra.mxu1 %v2065_v1  ;;  %2957 = vmatprep.mubr.msk.bf16.mxu1 %vm3298_vm0, %v3297_v0 }
0x1402   :  { %2967 = vmatprep.subr.bf16.mxu1 %v3297_v0 }
0x1406   :  { %2952 = vmatmul.mubr.msk.bf16.vlgmr.msra.gmra.mrb[60].mxu0 %vm189_vm2, %v2008_v8 }
0x1407   :  { %2963 = vmatprep.mubr.msk.bf16.mxu0 %vm3298_vm0, %v3297_v0 }
0x1408   :  { %2958 = vmatmul.mubr.msk.bf16.vlgmr.msra.gmra.mrb[68].mxu1 %vm189_vm2, %v2058_v30 }
0x1409   :  { %2969 = vmatprep.mubr.msk.bf16.mxu1 %vm3298_vm0, %v3297_v0 }
0x14d1   :  { %v1953_v32 = vpop.f32.mrb[56].mxu0 }
0x14d2   :  { %v2941_v33 = vpop.f32.mrb[57].mxu0 }
0x14d3   :  { %v1956_v34 = vpop.f32.mrb[58].mxu0  ;;  %v2001_v35 = vpop.f32.mrb[64].mxu1 }
0x14d4   :  { %v3044_v36 = vpack.i.bf16 %v2001_v35, %v1953_v32  ;;  %v2942_v38 = vpop.f32.mrb[59].mxu0  ;;  %v2947_v39 = vpop.f32.mrb[65].mxu1 }
0x14d5   :  { %v2004_v44 = vpop.f32.mrb[66].mxu1 }
0x14d6   :  { %v2948_v46 = vpop.f32.mrb[67].mxu1 }
0x14d9   :  { %v2051_v47 = vpop.f32.mrb[60].mxu0 }
0x14da   :  { %v2953_v51 = vpop.f32.mrb[61].mxu0  ;;  %v2107_v54 = vsel %vm189_vm2, %v2051_v47, -inf }
0x14db   :  { %2108 = vmax.xlane.f32.xlu1 %v2107_v54  ;;  %v2054_v55 = vpop.f32.mrb[62].mxu0  ;;  %v2101_v57 = vpop.f32.mrb[68].mxu1 }
0x14dc   :  { %v2954_v58 = vpop.f32.mrb[63].mxu0  ;;  %v2959_v60 = vpop.f32.mrb[69].mxu1  ;;  %v2110_v61 = vsel %vm189_vm2, %v2101_v57, -inf }
0x14dd   :  { %2111 = vmax.xlane.f32.xlu0 %v2110_v61  ;;  %v2104_v62 = vpop.f32.mrb[70].mxu1 }
0x14de   :  { %v2960_v2 = vpop.f32.mrb[71].mxu1 }
0x1568   :  { %v2109_v4 = vpop.xlane.xlu1 %2108 }
0x1569   :  { %v2113_v7 = vsub.f32 %v2051_v47, %v2109_v4 }
0x156a   :  { %v2112_v9 = vpop.xlane.xlu0 %2111 }
0x156b   :  { %v2115_v10 = vmul.f32 1.442695, %v2113_v7  ;;  %v2114_v11 = vsub.f32 %v2101_v57, %v2112_v9 }
0x156d   :  { %3133 = vpow2.f32 %v2115_v10  ;;  %v2117_v13 = vmul.f32 1.442695, %v2114_v11 }
0x156f   :  { %3135 = vpow2.f32 %v2117_v13 }
0x1577   :  { %v3134_v3 = vpop.eup %3133 }
0x1578   :  { %v2119_v12 = vsel %vm189_vm2, %v3134_v3, 0.0 }
0x1579   :  { %v3136_v48 = vpop.eup %3135  ;;  %2120 = vadd.xlane.f32.xlu0 %v2119_v12 }
0x157a   :  { %v2122_v52 = vsel %vm189_vm2, %v3136_v48, 0.0 }
0x157b   :  { %2123 = vadd.xlane.f32.xlu1 %v2122_v52 }
0x158c   :  { %2179 = vrot.lane.b32.xlu1 %v3711_v59, %s3306_s24 }
0x158f   :  { %2131 = vrot.lane.b32.xlu0 %v3709_v49, %s3306_s24 }
0x1590   :  { %3040 = vrot.lane.b32.xlu1 %v3039_v6, %s3309_s29 }
0x1593   :  { %3045 = vrot.lane.b32.xlu0 %v3044_v36, %s3310_s30 }
0x1606   :  { %v2121_v53 = vpop.xlane.xlu0 %2120 }
0x1607   :  { %3137 = vrcp.f32 %v2121_v53  ;;  %v3066_v53 = vld [vmem:[#allocation10] sm:$0xff]  }
0x1608   :  { %v2124_v14 = vpop.xlane.xlu1 %2123 }
0x1609   :  { %3139 = vrcp.f32 %v2124_v14  ;;  %v3069_v14 = vld [vmem:[%s3965_s8 + $0x8] sm:$0xff]  }
0x160a   :  { %v2132_v15 = vpop.permute.xlu0 %2131 }
0x160b   :  { %v2137_v17 = vsel %vm313_vm3, %v2132_v15, 0 }
0x160c   :  { %v2180_v18 = vpop.permute.xlu1 %2179  ;;  %2962 = vmatpush3.bf16.msra.mxu0 %v2137_v17 }
0x160d   :  { %v2185_v59 = vsel %vm313_vm3, %v2180_v18, 0  ;;  %2973 = vmatprep.subr.bf16.mxu0 %v3297_v0 }
0x160e   :  { %2968 = vmatpush3.bf16.msra.mxu1 %v2185_v59  ;;  %v3046_v33 = vpop.permute.xlu0 %3045 }
0x160f   :  { %2981 = vmatprep.subr.bf16.mxu1 %v3297_v0  ;;  %v3048_v36 = vunpack.i.h.bf16 %v3046_v33  ;;  %v3047_v38 = vunpack.i.l.bf16 %v3046_v33 }
0x1610   :  { %v3041_v8 = vpop.permute.xlu1 %3040 }
0x1611   :  { %v3138_v49 = vpop.eup %3137  ;;  %v3043_v30 = vunpack.i.h.bf16 %v3041_v8  ;;  %v3042_v32 = vunpack.i.l.bf16 %v3041_v8 }
0x1612   :  { %v2127_v37 = vmul.f32 %v3138_v49, %v3134_v3 }
0x1613   :  { %v3140_v42 = vpop.eup %3139  ;;  %v2252_v34 = vsel %vm189_vm2, %v3773_v50, %v3043_v30  ;;  %v2251_v35 = vsel %vm189_vm2, %v3771_v45, %v3042_v32  ;;  %v2264_v45 = vsub.s32 4, %v3477_v5  ;;  %v3894_v50 = vld [vmem:[%s3966_s9] sm:$0xff] }
0x1614   :  { %v2128_v6 = vmul.f32 %v3140_v42, %v3136_v48  ;;  %v2129_v19 = vpack.c.bf16 %v2127_v37, %v2127_v37  ;;  %v2253_v47 = vsel %vm1091_vm4, %v2251_v35, %v3047_v38  ;;  %v2254_v51 = vsel %vm1091_vm4, %v2252_v34, %v3048_v36 }
0x1615   :  { %v2265_v58 = vrot.slane %v3894_v50, %v2264_v45  ;;  %v2373_v36 = vsub.s32 5, %v3477_v5 }
0x1616   :  { %2964 = vmatmul.mubr.msk.bf16.vlgmr.msra.gmra.mrb[64].mxu0 %vm189_vm2, %v2129_v19  ;;  %v2130_v20 = vpack.c.bf16 %v2128_v6, %v2128_v6 }
0x1617   :  { %2977 = vmatprep.mubr.msk.bf16.mxu0 %vm3298_vm0, %v3297_v0  ;;  %2974 = vmatpush3.bf16.msra.mxu0 %v3064_v21  ;;  %v2374_v38 = vrot.slane %v3894_v50, %v2373_v36 }
0x1618   :  { %2970 = vmatmul.mubr.msk.bf16.vlgmr.msra.gmra.mrb[72].mxu1 %vm189_vm2, %v2130_v20  ;;  %2975 = vmatprep.subr.bf16.mxu0 %v3297_v0 }
0x1619   :  { %2985 = vmatprep.mubr.msk.bf16.mxu1 %vm3298_vm0, %v3297_v0  ;;  %2982 = vmatpush3.bf16.msra.mxu1 %v3066_v53 }
0x161a   :  { %2983 = vmatprep.subr.bf16.mxu1 %v3297_v0 }
0x161b   :  { %2976 = vmatpush3.bf16.msra.mxu0 %v3065_v22 }
0x161c   :  { %2989 = vmatprep.subr.bf16.mxu0 %v3297_v0 }
0x16e9   :  { %v2173_v23 = vpop.f32.mrb[64].mxu0 }
0x16ea   :  { %v2965_v16 = vpop.f32.mrb[65].mxu0 }
0x16eb   :  { %v2176_v24 = vpop.f32.mrb[66].mxu0  ;;  %v2221_v25 = vpop.f32.mrb[72].mxu1 }
0x16ec   :  { %v3049_v26 = vpack.i.bf16 %v2221_v25, %v2173_v23  ;;  %v2966_v27 = vpop.f32.mrb[67].mxu0  ;;  %v2971_v28 = vpop.f32.mrb[73].mxu1  ;;  %v2355_v24 = vrot.slane %v3691_v31, %v1104_v63  ;;  %v3070_v63 = vld [vmem:[%s3965_s8 + $0x10] sm:$0xff]  }
0x16ed   :  { %v2224_v29 = vpop.f32.mrb[74].mxu1 }
0x16ee   :  { %3050 = vrot.lane.b32.xlu1 %v3049_v26, %s3311_s5  ;;  %v2972_v1 = vpop.f32.mrb[75].mxu1  ;;  %v2363_v29 = vrot.slane %v3691_v31, %v1216_v56  ;;  %v3071_v56 = vld [vmem:[%s3965_s8 + $0x18] sm:$0xff]  }
0x1760   :  { %v3051_v39 = vpop.permute.xlu1 %3050 }
0x1761   :  { %v3053_v44 = vunpack.i.h.bf16 %v3051_v39  ;;  %v3052_v46 = vunpack.i.l.bf16 %v3051_v39 }
0x1763   :  { %v2256_v54 = vsel %vm1094_vm5, %v2254_v51, %v3053_v44  ;;  %v2255_v55 = vsel %vm1094_vm5, %v2253_v47, %v3052_v46 }
0x1764   :  { %v2257_v57 = vpack.c.bf16 %v2256_v54, %v2255_v55 }
0x1766   :  { %2978 = vmatmul.mubr.msk.bf16.vlgmr.msra.gmra.mrb[68].mxu0 %vm136_vm1, %v2257_v57 }
0x1767   :  { %2997 = vmatprep.mubr.msk.bf16.mxu0 %vm3298_vm0, %v3297_v0 }
0x1839   :  { %v2315_v60 = vpop.f32.mrb[68].mxu0 }
0x183a   :  { %v2316_v61 = vadd.f32 %v2315_v60, %v2265_v58  ;;  %v2979_v62 = vpop.f32.mrb[69].mxu0 }
0x183b   :  { %v2318_v2 = vpop.f32.mrb[70].mxu0 }
0x183c   :  { %v2322_v4 = vadd.f32 %v2316_v61, %v3696_v40  ;;  %v2319_v7 = vadd.f32 %v2318_v2, %v2265_v58  ;;  %v2980_v9 = vpop.f32.mrb[71].mxu0  ;;  %v3067_v40 = vld [vmem:[#allocation10 + $0x8] sm:$0xff]  }
0x183d   :  { %2984 = vmatpush3.bf16.msra.mxu1 %v3067_v40 }
0x183e   :  { %v2323_v10 = vadd.f32 %v2319_v7, %v3698_v41  ;;  %v2324_v11 = vsel %vm136_vm1, %v2322_v4, 0.0  ;;  %v2332_v13 = vmul.f32 %v2322_v4, %v2322_v4  ;;  %v3068_v41 = vld [vmem:[%s3965_s8] sm:$0xff]   ;;  %s3312_s8 = smov [#allocation11]  }
0x183f   :  { %2325 = vadd.xlane.f32.xlu0 %v2324_v11  ;;  %2990 = vmatpush3.bf16.msra.mxu0 %v3068_v41  ;;  %s2575_s23 = sshll.u32 %s3312_s8, 4  ;;  %s2576_s23 = int_to_ptr.vmem [resolvable:$true] %s2575_s23 }
0x1840   :  { %v2327_v3 = vsel %vm136_vm1, %v2323_v10, 0.0  ;;  %v2334_v12 = vsel %vm136_vm1, %v2332_v13, 0.0  ;;  %v2333_v48 = vmul.f32 %v2323_v10, %v2323_v10  ;;  %2991 = vmatprep.subr.bf16.mxu0 %v3297_v0  ;;  %s3260_s24 = scalar_lea.vmem %s2576_s23, 128  ;;  %p3265_p13 = scmp.lt.s32.totalorder %s2576_s23, %s2576_s23 }
0x1841   :  { %2328 = vadd.xlane.f32.xlu1 %v2327_v3  ;;  %p3261_p12 = scmp.ne.s32.totalorder %s2576_s23, %s3260_s24  ;;  %p3266_p0 = scmp.lt.s32.totalorder %s3260_s24, %s3260_s24 }
0x1842   :  { %v2337_v52 = vsel %vm136_vm1, %v2333_v48, 0.0 }
0x1843   :  { %2335 = vadd.xlane.f32.xlu0 %v2334_v12  ;;  %2992 = vmatpush3.bf16.msra.mxu0 %v3069_v14  ;;  %p3267_p1 = por %p3266_p0, %p3265_p13 }
0x1844   :  { %2993 = vmatprep.subr.bf16.mxu0 %v3297_v0 }
0x1845   :  { %p3268_p2 = pnand %p3267_p1, %p3261_p12 }
0x1847   :  { %2338 = vadd.xlane.f32.xlu0 %v2337_v52  ;;  %2994 = vmatpush3.bf16.msra.mxu0 %v3070_v63 }
0x1848   :  { %2995 = vmatprep.subr.bf16.mxu0 %v3297_v0  ;;  %v2444_v0 = vsub.s32 6, %v3477_v5 }
0x184a   :  { %v2445_v60 = vrot.slane %v3894_v50, %v2444_v0 }
0x184b   :  { %2996 = vmatpush3.bf16.msra.mxu0 %v3071_v56 }
0x18cc   :  { %v2326_v15 = vpop.xlane.xlu0 %2325 }
0x18cd   :  { %v2330_v17 = vmul.f32 0.03125, %v2326_v15 }
0x18ce   :  { %v2329_v18 = vpop.xlane.xlu1 %2328 }
0x18cf   :  { %v2342_v49 = vmul.f32 %v2330_v17, %v2330_v17  ;;  %v2331_v37 = vmul.f32 0.03125, %v2329_v18  ;;  %v2346_v27 = vsub.f32 %v2322_v4, %v2330_v17 }
0x18d0   :  { %v2336_v59 = vpop.xlane.xlu0 %2335 }
0x18d1   :  { %v2340_v42 = vmul.f32 0.03125, %v2336_v59  ;;  %v2343_v20 = vmul.f32 %v2331_v37, %v2331_v37  ;;  %v2347_v1 = vsub.f32 %v2323_v10, %v2331_v37 }
0x18d3   :  { %v2344_v6 = vsub.f32 %v2340_v42, %v2342_v49 }
0x18d4   :  { %v2339_v19 = vpop.xlane.xlu0 %2338 }
0x18d5   :  { %v2348_v21 = vadd.f32 1e-05, %v2344_v6  ;;  %v2341_v22 = vmul.f32 0.03125, %v2339_v19 }
0x18d7   :  { %3141 = vrsqrt.f32 %v2348_v21  ;;  %v2345_v23 = vsub.f32 %v2341_v22, %v2343_v20  ;;  %v2548_v21 = vrot.slane %v3691_v31, %v1280_v43 }
0x18d9   :  { %v2349_v16 = vadd.f32 1e-05, %v2345_v23  ;;  %v2556_v23 = vrot.slane %v3691_v31, %v2264_v45 }
0x18db   :  { %3143 = vrsqrt.f32 %v2349_v16 }
0x18e1   :  { %v3142_v25 = vpop.eup %3141 }
0x18e2   :  { %v2356_v26 = vmul.f32 %v3142_v25, %v2355_v24 }
0x18e4   :  { %v2358_v30 = vmul.f32 %v2356_v26, %v2346_v27 }
0x18e5   :  { %v3144_v28 = vpop.eup %3143 }
0x18e6   :  { %v2357_v8 = vmul.f32 %v3144_v28, %v2355_v24  ;;  %v2364_v33 = vadd.f32 %v2363_v29, %v2358_v30 }
0x18e8   :  { %v2359_v32 = vmul.f32 %v2357_v8, %v2347_v1 }
0x18ea   :  { %v2365_v34 = vadd.f32 %v2363_v29, %v2359_v32 }
0x18ec   :  { %v2366_v35 = vpack.c.bf16 %v2365_v34, %v2364_v33 }
0x18ee   :  { %2986 = vmatmul.mubr.msk.bf16.vlgmr.msra.gmra.mrb[76].mxu1 %vm136_vm1, %v2366_v35 }
0x19c1   :  { %v2424_v39 = vpop.f32.mrb[76].mxu1 }
0x19c2   :  { %v2425_v44 = vadd.f32 %v2424_v39, %v2374_v38  ;;  %v2987_v46 = vpop.f32.mrb[77].mxu1 }
0x19c3   :  { %v2427_v47 = vpop.f32.mrb[78].mxu1 }
0x19c4   :  { %v2428_v51 = vadd.f32 %v2427_v47, %v2374_v38  ;;  %v2988_v54 = vpop.f32.mrb[79].mxu1  ;;  %v2431_v55 = vmax.f32 %v2425_v44, 0.0 }
0x19c6   :  { %v2432_v57 = vmax.f32 %v2428_v51, 0.0 }
0x19c8   :  { %v2433_v58 = vpack.c.bf16 %v2432_v57, %v2431_v55 }
0x19ca   :  { %2998 = vmatmul.mubr.msk.bf16.vlgmr.msra.gmra.mrb[72].mxu0 %vm2470_vm6, %v2433_v58 }
0x1a9d   :  { %v2508_v61 = vpop.f32.mrb[72].mxu0 }
0x1a9e   :  { %v2509_v62 = vadd.f32 %v2508_v61, %v2445_v60  ;;  %v2999_v2 = vpop.f32.mrb[73].mxu0 }
0x1a9f   :  { %v2511_v4 = vpop.f32.mrb[74].mxu0 }
0x1aa0   :  { %v2515_v7 = vadd.f32 %v2509_v62, %v2364_v33  ;;  %v2512_v9 = vadd.f32 %v2511_v4, %v2445_v60  ;;  %v3000_v10 = vpop.f32.mrb[75].mxu0 }
0x1aa2   :  { %v2516_v11 = vadd.f32 %v2512_v9, %v2365_v34  ;;  %v2517_v13 = vsel %vm136_vm1, %v2515_v7, 0.0  ;;  %v2525_v3 = vmul.f32 %v2515_v7, %v2515_v7 }
0x1aa3   :  { %2518 = vadd.xlane.f32.xlu1 %v2517_v13 }
0x1aa4   :  { %v2520_v12 = vsel %vm136_vm1, %v2516_v11, 0.0  ;;  %v2526_v48 = vmul.f32 %v2516_v11, %v2516_v11  ;;  %v2527_v52 = vsel %vm136_vm1, %v2525_v3, 0.0 }
0x1aa5   :  { %2521 = vadd.xlane.f32.xlu0 %v2520_v12 }
0x1aa6   :  { %v2530_v50 = vsel %vm136_vm1, %v2526_v48, 0.0 }
0x1aa7   :  { %2528 = vadd.xlane.f32.xlu1 %v2527_v52 }
0x1aa9   :  { %2531 = vadd.xlane.f32.xlu0 %v2530_v50 }
0x1b30   :  { %v2519_v53 = vpop.xlane.xlu1 %2518 }
0x1b31   :  { %v2523_v40 = vmul.f32 0.03125, %v2519_v53 }
0x1b32   :  { %v2522_v41 = vpop.xlane.xlu0 %2521 }
0x1b33   :  { %v2524_v14 = vmul.f32 0.03125, %v2522_v41  ;;  %v2535_v17 = vmul.f32 %v2523_v40, %v2523_v40  ;;  %v2539_v16 = vsub.f32 %v2515_v7, %v2523_v40 }
0x1b34   :  { %v2529_v15 = vpop.xlane.xlu1 %2528 }
0x1b35   :  { %v2533_v18 = vmul.f32 0.03125, %v2529_v15  ;;  %v2536_v49 = vmul.f32 %v2524_v14, %v2524_v14  ;;  %v2540_v26 = vsub.f32 %v2516_v11, %v2524_v14 }
0x1b36   :  { %v2532_v59 = vpop.xlane.xlu0 %2531 }
0x1b37   :  { %v2537_v37 = vsub.f32 %v2533_v18, %v2535_v17  ;;  %v2534_v42 = vmul.f32 0.03125, %v2532_v59 }
0x1b39   :  { %v2541_v6 = vadd.f32 1e-05, %v2537_v37  ;;  %v2538_v19 = vsub.f32 %v2534_v42, %v2536_v49 }
0x1b3b   :  { %3145 = vrsqrt.f32 %v2541_v6  ;;  %v2542_v20 = vadd.f32 1e-05, %v2538_v19 }
0x1b3d   :  { %3147 = vrsqrt.f32 %v2542_v20 }
0x1b45   :  { %v3146_v22 = vpop.eup %3145 }
0x1b46   :  { %v2549_v24 = vmul.f32 %v3146_v22, %v2548_v21 }
0x1b47   :  { %v3148_v25 = vpop.eup %3147 }
0x1b48   :  { %v2550_v27 = vmul.f32 %v3148_v25, %v2548_v21  ;;  %v2551_v28 = vmul.f32 %v2549_v24, %v2539_v16 }
0x1b4a   :  { %v2552_v29 = vmul.f32 %v2550_v27, %v2540_v26  ;;  %v2557_v1 = vadd.f32 %v2556_v23, %v2551_v28 }
0x1b4c   :  { %v2558_v8 = vadd.f32 %v2556_v23, %v2552_v29  ;;  %v2660_v30 = vpack.c.bf16 %v2557_v1, %v2557_v1 }
0x1b4e   :  { %v2661_v32 = vpack.c.bf16 %v2558_v8, %v2558_v8  ;;  %2568 = vst.msk [vmem:[#allocation11] sm:$0xf] %vm2567_vm7, %v2660_v30 }
0x1b50   :  { %2569 = vst.msk [vmem:[#allocation11 + $0x4] sm:$0xf] %vm2567_vm7, %v2661_v32 }
0x1b51   :  { %3271 = shalt.err (!%p3268_p2)
}
0x1b52   :  { %s3272_s29 = scalar_lea.hbm %s3967_s10, 128 }
0x1b53   :  { %p3273_p3 = scmp.ne.s32.totalorder %s3967_s10, %s3272_s29  ;;  %p3276_p4 = scmp.lt.u32.totalorder %s3272_s29, %s3967_s10 }
0x1b55   :  { %p3278_p5 = pnand %p3276_p4, %p3273_p3 }
0x1b57   :  { %3281 = shalt.err (!%p3278_p5)
}
0x1b58   :  { %2581 = dma.vmem_to_hbm [thread:$0]  %s2576_s23, 128, %s3967_s10, [#allocation4], %s3292_s25, %s3292_s25, %s3293_s26  }
0x1b59   :  { %3288 = dma.done.wait [#allocation4], 128  }
0x1b5a   :  { %3289 = vsyncadd [#allocation4], 4294967168 }
0x1b5b   :  { %2585 = vsyncpa [#allocation3], 1 }
0x1b5c   :  { %2586 = vsyncpa [#allocation6], 1 }
0x1b5d   :  { %2587 = vsyncpa [#allocation9], 1 }
0x1b5e   :  { %2588 = vsyncpa [#allocation4], 1 }

</bundles_post_ra>
